<compile_context>
chip_gen: v7x
topology: tpu7x:2x2x1
jax: 0.10.0
libtpu: 0.0.40
codegen_flags: <defaults>
</compile_context>

<pallas_src>
import functools

import jax
import jax.numpy as jnp
import numpy as np
from jax import lax
from jax.experimental import pallas as pl
from jax.experimental.pallas import tpu as pltpu


# ----------------------------------------------------------------------------
# Kernel: one full bottleneck block per batch element (grid over N).
# ----------------------------------------------------------------------------
def bottleneck_kernel(
    x_ref,        # (1, H, W, Cin)            fp32 input block
    w1_ref,       # (Cin, P)                  bf16, bn1 scale folded in
    w2_ref,       # (3, 3P, P)                bf16, [kw, kh*P+in, out], bn2 folded
    w3d_ref,      # (P, 4P) or (P+Cin, 4P)    bf16, bn3 (+bn_d) scale folded in
    b1_ref,       # (1, P)   fp32 bias
    b2_ref,       # (1, P)   fp32 bias
    b3d_ref,      # (1, 4P)  fp32 bias (b3 + bd when downsample is fused)
    out_ref,      # (1, H, W, 4P)
    padh_ref,     # scratch VMEM: (H+2, W, P) bf16, zero-padded along H only
    *, H, W, has_downsample,
):
    Cin = x_ref.shape[-1]
    P = w1_ref.shape[-1]
    Cout = w3d_ref.shape[-1]
    HW = H * W

    x32 = x_ref[0].reshape(HW, Cin)                 # fp32 (residual path)
    xb = x32.astype(jnp.bfloat16)                   # bf16 (matmul path)

    # --- conv1 (1x1) + bias + relu  (bn1 scale folded into w1) ---------------
    h1 = jnp.dot(xb, w1_ref[...], preferred_element_type=jnp.float32)
    h1 = jnp.maximum(h1 + b1_ref[...], 0.0)                    # (HW, P) fp32

    # --- conv2 (3x3, pad=1, stride=1) + bias + relu --------------------------
    # Pad only along H (leading dim -> contiguous, aligned slices). The three
    # kh-slices are concatenated along channels (K = 3P), so only 3 matmuls.
    # The dw = -1/+1 taps are handled by rolling the matmul outputs along the
    # flattened row axis and masking the wrapped columns.
    padh_ref[0] = jnp.zeros((W, P), jnp.bfloat16)              # cheap border rows,
    padh_ref[H + 1] = jnp.zeros((W, P), jnp.bfloat16)          # safe under megacore
    padh_ref[1:H + 1] = h1.astype(jnp.bfloat16).reshape(H, W, P)

    xcat = jnp.concatenate(
        [padh_ref[0:H].reshape(HW, P),          # rows h-1
         padh_ref[1:H + 1].reshape(HW, P),      # rows h
         padh_ref[2:H + 2].reshape(HW, P)],     # rows h+1
        axis=-1)                                                # (HW, 3P) bf16

    q0 = jnp.dot(xcat, w2_ref[0], preferred_element_type=jnp.float32)  # kw = -1 tap
    q1 = jnp.dot(xcat, w2_ref[1], preferred_element_type=jnp.float32)  # kw =  0 tap
    q2 = jnp.dot(xcat, w2_ref[2], preferred_element_type=jnp.float32)  # kw = +1 tap

    wcol = lax.broadcasted_iota(jnp.int32, (H, W, P), 1).reshape(HW, P)
    conv2 = q1
    conv2 = conv2 + jnp.where(wcol >= 1,
                              pltpu.roll(q0, shift=1, axis=0), 0.0)
    conv2 = conv2 + jnp.where(wcol <= W - 2,
                              pltpu.roll(q2, shift=HW - 1, axis=0), 0.0)

    h2 = jnp.maximum(conv2 + b2_ref[...], 0.0).astype(jnp.bfloat16)    # (HW, P)

    # --- conv3 (1x1) fused with downsample (1x1), + bias, residual, relu -----
    if has_downsample:
        # one matmul with K = P + Cin; bias already contains b3 + bd
        inp3 = jnp.concatenate([h2, xb], axis=-1)               # (HW, P+Cin)
    else:
        inp3 = h2
    h3 = jnp.dot(inp3, w3d_ref[...], preferred_element_type=jnp.float32)
    h3 = h3 + b3d_ref[...]
    if not has_downsample:
        h3 = h3 + x32                                           # identity shortcut

    out = jnp.maximum(h3, 0.0)
    out_ref[0] = out.reshape(H, W, Cout).astype(out_ref.dtype)


# ----------------------------------------------------------------------------
# Host-side parameter preparation: fold BN scales into weights, cast to bf16,
# regroup the 3x3 weights kw-major, fuse conv3 + downsample weights/biases.
# ----------------------------------------------------------------------------
def prepare_kernel_params(params):
    P = params["w1"].shape[-1]
    has_downsample = "wd" in params
    s1, b1 = params["s1"], params["b1"]
    s2, b2 = params["s2"], params["b2"]
    s3, b3 = params["s3"], params["b3"]

    w1k = (params["w1"] * s1[None, :]).astype(jnp.bfloat16)

    w2s = params["w2"] * s2[None, None, None, :]        # (3,3,P,P) [kh,kw,in,out]
    w2k = jnp.stack([w2s[:, kw].reshape(3 * P, P) for kw in range(3)],
                    axis=0).astype(jnp.bfloat16)        # (3, 3P, P) kw-major

    w3s = params["w3"] * s3[None, :]
    if has_downsample:
        wds = params["wd"] * params["sd"][None, :]
        w3d = jnp.concatenate([w3s, wds], axis=0).astype(jnp.bfloat16)
        b3d = (b3 + params["bd"]).reshape(1, -1)
    else:
        w3d = w3s.astype(jnp.bfloat16)
        b3d = b3.reshape(1, -1)

    kp = {
        "w1": w1k, "w2": w2k, "w3d": w3d,
        "b1": b1.reshape(1, -1).astype(jnp.float32),
        "b2": b2.reshape(1, -1).astype(jnp.float32),
        "b3d": b3d.astype(jnp.float32),
    }
    return kp, has_downsample


def _full_spec(a):
    nd = a.ndim
    return pl.BlockSpec(a.shape, lambda n, _nd=nd: (0,) * _nd)


# ----------------------------------------------------------------------------
# Wrapper: NCHW in / NCHW out, grid over the batch dimension.
# ----------------------------------------------------------------------------
def bottleneck_forward(x_nchw, params, stride=1):
    assert stride == 1, "only stride=1 is supported by this kernel"

    x = jnp.transpose(x_nchw, (0, 2, 3, 1))          # NHWC
    N, H, W, Cin = x.shape
    P = params["w1"].shape[-1]
    Cout = params["w3"].shape[-1]

    kp, has_ds = prepare_kernel_params(params)

    names = ["w1", "w2", "w3d", "b1", "b2", "b3d"]
    in_specs = [pl.BlockSpec((1, H, W, Cin), lambda n: (n, 0, 0, 0))]
    in_specs += [_full_spec(kp[k]) for k in names]

    out = pl.pallas_call(
        functools.partial(bottleneck_kernel, H=H, W=W, has_downsample=has_ds),
        out_shape=jax.ShapeDtypeStruct((N, H, W, Cout), x.dtype),
        grid_spec=pltpu.PrefetchScalarGridSpec(
            num_scalar_prefetch=0,
            grid=(N,),
            in_specs=in_specs,
            out_specs=pl.BlockSpec((1, H, W, Cout), lambda n: (n, 0, 0, 0)),
            scratch_shapes=[pltpu.VMEM((H + 2, W, P), jnp.bfloat16)],
        ),
        compiler_params=pltpu.CompilerParams(
            dimension_semantics=("parallel",),
            vmem_limit_bytes=32 * 1024 * 1024,
        ),
    )(x, *[kp[k] for k in names])

    return jnp.transpose(out, (0, 3, 1, 2))          # back to NCHW


# ----------------------------------------------------------------------------
# Pure-JAX reference (same math, via lax.conv_general_dilated) for validation.
# ----------------------------------------------------------------------------
def bottleneck_reference(x_nchw, params):
    x = jnp.transpose(x_nchw, (0, 2, 3, 1))
    Cin = x.shape[-1]
    P = params["w1"].shape[-1]
    Cout = params["w3"].shape[-1]
    dn = ("NHWC", "HWIO", "NHWC")

    def bn(h, s, b):
        return h * s.reshape(1, 1, 1, -1) + b.reshape(1, 1, 1, -1)

    h = lax.conv_general_dilated(x, params["w1"].reshape(1, 1, Cin, P),
                                 (1, 1), "VALID", dimension_numbers=dn)
    h = jax.nn.relu(bn(h, params["s1"], params["b1"]))

    h = lax.conv_general_dilated(h, params["w2"],          # (3,3,P,P) is HWIO
                                 (1, 1), ((1, 1), (1, 1)), dimension_numbers=dn)
    h = jax.nn.relu(bn(h, params["s2"], params["b2"]))

    h = lax.conv_general_dilated(h, params["w3"].reshape(1, 1, P, Cout),
                                 (1, 1), "VALID", dimension_numbers=dn)
    h = bn(h, params["s3"], params["b3"])

    if "wd" in params:
        d = lax.conv_general_dilated(x, params["wd"].reshape(1, 1, Cin, Cout),
                                     (1, 1), "VALID", dimension_numbers=dn)
        d = bn(d, params["sd"], params["bd"])
    else:
        d = x

    out = jax.nn.relu(h + d)
    return jnp.transpose(out, (0, 3, 1, 2))


# ----------------------------------------------------------------------------
# Deterministic parameter construction (synthetic weights, folded eval-mode BN).
# ----------------------------------------------------------------------------
def make_params(key, in_planes, planes, expansion=4, eps=1e-5):
    out_planes = expansion * planes
    keys = jax.random.split(key, 8)

    def bn_fold(k, c):
        kg, kb, km, kv = jax.random.split(k, 4)
        gamma = 1.0 + 0.1 * jax.random.normal(kg, (c,), jnp.float32)
        beta = 0.1 * jax.random.normal(kb, (c,), jnp.float32)
        mean = 0.1 * jax.random.normal(km, (c,), jnp.float32)
        var = 1.0 + 0.1 * jnp.abs(jax.random.normal(kv, (c,), jnp.float32))
        scale = gamma / jnp.sqrt(var + eps)
        bias = beta - mean * scale
        return scale, bias

    params = {
        # conv weights stored as matmul matrices / HWIO for the 3x3
        "w1": 0.1 * jax.random.normal(keys[0], (in_planes, planes), jnp.float32),
        "w2": 0.1 * jax.random.normal(keys[1], (3, 3, planes, planes), jnp.float32),
        "w3": 0.1 * jax.random.normal(keys[2], (planes, out_planes), jnp.float32),
    }
    params["s1"], params["b1"] = bn_fold(keys[3], planes)
    params["s2"], params["b2"] = bn_fold(keys[4], planes)
    params["s3"], params["b3"] = bn_fold(keys[5], out_planes)

    if in_planes != out_planes:       # downsample branch (stride=1 case)
        params["wd"] = 0.1 * jax.random.normal(keys[6], (in_planes, out_planes),
                                               jnp.float32)
        params["sd"], params["bd"] = bn_fold(keys[7], out_planes)
    return params


if __name__ == "__main__":
    key = jax.random.PRNGKey(0)
    k1, k2, k3, k4 = jax.random.split(key, 4)

    # Block A: Bottleneck(in_planes=4, planes=4) -> real downsample branch
    N, Cin, H, W, planes = 2, 4, 16, 16, 4
    x1 = jax.random.normal(k1, (N, Cin, H, W), jnp.float32)   # NCHW, like PyTorch
    p1 = make_params(k2, Cin, planes)
    y1 = jax.block_until_ready(bottleneck_forward(x1, p1, stride=1))
    y1_ref = jax.block_until_ready(bottleneck_reference(x1, p1))
    np.testing.assert_allclose(np.asarray(y1), np.asarray(y1_ref),
                               rtol=5e-2, atol=3e-2)
    assert y1.shape == (N, 4 * planes, H, W)

    # Block B: Bottleneck(in_planes=16, planes=4) -> identity shortcut path
    Cin2 = 4 * planes
    x2 = jax.random.normal(k3, (N, Cin2, H, W), jnp.float32)
    p2 = make_params(k4, Cin2, planes)
    y2 = jax.block_until_ready(bottleneck_forward(x2, p2, stride=1))
    y2_ref = jax.block_until_ready(bottleneck_reference(x2, p2))
    np.testing.assert_allclose(np.asarray(y2), np.asarray(y2_ref),
                               rtol=5e-2, atol=3e-2)
    assert y2.shape == (N, 4 * planes, H, W)

    print("KERNEL_OK")
</pallas_src>

<mosaic_0001>
module attributes {stable_mosaic.version = 11 : i64} {
  func.func @bottleneck_kernel(%arg0: i32, %arg1: memref<1x16x16x4xf32, #tpu.memory_space<vmem>>, %arg2: memref<4x4xbf16, #tpu.memory_space<vmem>>, %arg3: memref<3x12x4xbf16, #tpu.memory_space<vmem>>, %arg4: memref<8x16xbf16, #tpu.memory_space<vmem>>, %arg5: memref<1x4xf32, #tpu.memory_space<vmem>>, %arg6: memref<1x4xf32, #tpu.memory_space<vmem>>, %arg7: memref<1x16xf32, #tpu.memory_space<vmem>>, %arg8: memref<1x16x16x16xf32, #tpu.memory_space<vmem>>, %arg9: memref<18x16x4xbf16, #tpu.memory_space<vmem>>) attributes {dimension_semantics = [#tpu.dimension_semantics<parallel>], iteration_bounds = array<i64: 2>, scalar_prefetch = 0 : i64, scratch_operands = 1 : i64, tpu.core_type = #tpu.core_type<tc>, window_params = [{transform_indices = @transform_0, window_bounds = array<i64: 1, 16, 16, 4>}, {pipeline_mode = #tpu.pipeline_mode<synchronous>, transform_indices = @transform_1, window_bounds = array<i64: 4, 4>}, {pipeline_mode = #tpu.pipeline_mode<synchronous>, transform_indices = @transform_2, window_bounds = array<i64: 3, 12, 4>}, {pipeline_mode = #tpu.pipeline_mode<synchronous>, transform_indices = @transform_3, window_bounds = array<i64: 8, 16>}, {pipeline_mode = #tpu.pipeline_mode<synchronous>, transform_indices = @transform_4, window_bounds = array<i64: 1, 4>}, {pipeline_mode = #tpu.pipeline_mode<synchronous>, transform_indices = @transform_5, window_bounds = array<i64: 1, 4>}, {pipeline_mode = #tpu.pipeline_mode<synchronous>, transform_indices = @transform_6, window_bounds = array<i64: 1, 16>}, {transform_indices = @transform_7, window_bounds = array<i64: 1, 16, 16, 16>}]} {
    %c0 = arith.constant 0 : index
    %c0_0 = arith.constant 0 : index
    %c0_1 = arith.constant 0 : index
    %c0_2 = arith.constant 0 : index
    %0 = vector.load %arg1[%c0, %c0_0, %c0_1, %c0_2] : memref<1x16x16x4xf32, #tpu.memory_space<vmem>>, vector<1x16x16x4xf32>
    %1 = vector.shape_cast %0 : vector<1x16x16x4xf32> to vector<16x16x4xf32>
    %2 = vector.shape_cast %1 : vector<16x16x4xf32> to vector<256x4xf32>
    %3 = arith.truncf %2 : vector<256x4xf32> to vector<256x4xbf16>
    %c0_3 = arith.constant 0 : index
    %c0_4 = arith.constant 0 : index
    %4 = vector.load %arg2[%c0_3, %c0_4] : memref<4x4xbf16, #tpu.memory_space<vmem>>, vector<4x4xbf16>
    %cst = arith.constant dense<0.000000e+00> : vector<256x4xf32>
    %5 = tpu.matmul %3, %4, %cst {dimension_numbers = #tpu.dot_dimension_numbers<[1], [0], [0], [1], [0, 0, 1, 1], [], []>} : vector<256x4xbf16>, vector<4x4xbf16>, vector<256x4xf32> -> vector<256x4xf32>
    %c0_5 = arith.constant 0 : index
    %c0_6 = arith.constant 0 : index
    %6 = vector.load %arg5[%c0_5, %c0_6] : memref<1x4xf32, #tpu.memory_space<vmem>>, vector<1x4xf32>
    %7 = vector.broadcast %6 : vector<1x4xf32> to vector<256x4xf32>
    %8 = arith.addf %5, %7 : vector<256x4xf32>
    %cst_7 = arith.constant 0.000000e+00 : f32
    %9 = vector.broadcast %cst_7 : f32 to vector<256x4xf32>
    %10 = arith.maximumf %8, %9 : vector<256x4xf32>
    %cst_8 = arith.constant 0.000000e+00 : bf16
    %11 = vector.broadcast %cst_8 : bf16 to vector<16x4xbf16>
    %c0_9 = arith.constant 0 : index
    %c0_10 = arith.constant 0 : index
    %c0_11 = arith.constant 0 : index
    %12 = vector.load %arg9[%c0_9, %c0_10, %c0_11] : memref<18x16x4xbf16, #tpu.memory_space<vmem>>, vector<1x16x4xbf16>
    %13 = vector.shape_cast %12 : vector<1x16x4xbf16> to vector<16x4xbf16>
    %14 = vector.shape_cast %11 : vector<16x4xbf16> to vector<1x16x4xbf16>
    tpu.vector_store %arg9[%c0_9, %c0_10, %c0_11], %14 {strides = array<i32>} : memref<18x16x4xbf16, #tpu.memory_space<vmem>>, vector<1x16x4xbf16>,
    %cst_12 = arith.constant 0.000000e+00 : bf16
    %15 = vector.broadcast %cst_12 : bf16 to vector<16x4xbf16>
    %c17 = arith.constant 17 : index
    %c0_13 = arith.constant 0 : index
    %c0_14 = arith.constant 0 : index
    %16 = vector.load %arg9[%c17, %c0_13, %c0_14] : memref<18x16x4xbf16, #tpu.memory_space<vmem>>, vector<1x16x4xbf16>
    %17 = vector.shape_cast %16 : vector<1x16x4xbf16> to vector<16x4xbf16>
    %18 = vector.shape_cast %15 : vector<16x4xbf16> to vector<1x16x4xbf16>
    tpu.vector_store %arg9[%c17, %c0_13, %c0_14], %18 {strides = array<i32>} : memref<18x16x4xbf16, #tpu.memory_space<vmem>>, vector<1x16x4xbf16>,
    %19 = arith.truncf %10 : vector<256x4xf32> to vector<256x4xbf16>
    %20 = vector.shape_cast %19 : vector<256x4xbf16> to vector<16x16x4xbf16>
    %c1 = arith.constant 1 : index
    %c0_15 = arith.constant 0 : index
    %c0_16 = arith.constant 0 : index
    %21 = vector.load %arg9[%c1, %c0_15, %c0_16] : memref<18x16x4xbf16, #tpu.memory_space<vmem>>, vector<16x16x4xbf16>
    tpu.vector_store %arg9[%c1, %c0_15, %c0_16], %20 {strides = array<i32>} : memref<18x16x4xbf16, #tpu.memory_space<vmem>>, vector<16x16x4xbf16>,
    %c0_17 = arith.constant 0 : index
    %c0_18 = arith.constant 0 : index
    %c0_19 = arith.constant 0 : index
    %22 = vector.load %arg9[%c0_17, %c0_18, %c0_19] : memref<18x16x4xbf16, #tpu.memory_space<vmem>>, vector<16x16x4xbf16>
    %23 = vector.shape_cast %22 : vector<16x16x4xbf16> to vector<256x4xbf16>
    %c1_20 = arith.constant 1 : index
    %c0_21 = arith.constant 0 : index
    %c0_22 = arith.constant 0 : index
    %24 = vector.load %arg9[%c1_20, %c0_21, %c0_22] : memref<18x16x4xbf16, #tpu.memory_space<vmem>>, vector<16x16x4xbf16>
    %25 = vector.shape_cast %24 : vector<16x16x4xbf16> to vector<256x4xbf16>
    %c2 = arith.constant 2 : index
    %c0_23 = arith.constant 0 : index
    %c0_24 = arith.constant 0 : index
    %26 = vector.load %arg9[%c2, %c0_23, %c0_24] : memref<18x16x4xbf16, #tpu.memory_space<vmem>>, vector<16x16x4xbf16>
    %27 = vector.shape_cast %26 : vector<16x16x4xbf16> to vector<256x4xbf16>
    %28 = tpu.concatenate %23, %25, %27 in 1 : vector<256x4xbf16>, vector<256x4xbf16>, vector<256x4xbf16> -> vector<256x12xbf16>
    %c0_25 = arith.constant 0 : index
    %c0_26 = arith.constant 0 : index
    %c0_27 = arith.constant 0 : index
    %29 = vector.load %arg3[%c0_25, %c0_26, %c0_27] : memref<3x12x4xbf16, #tpu.memory_space<vmem>>, vector<1x12x4xbf16>
    %30 = vector.shape_cast %29 : vector<1x12x4xbf16> to vector<12x4xbf16>
    %cst_28 = arith.constant dense<0.000000e+00> : vector<256x4xf32>
    %31 = tpu.matmul %28, %30, %cst_28 {dimension_numbers = #tpu.dot_dimension_numbers<[1], [0], [0], [1], [0, 0, 1, 1], [], []>} : vector<256x12xbf16>, vector<12x4xbf16>, vector<256x4xf32> -> vector<256x4xf32>
    %c1_29 = arith.constant 1 : index
    %c0_30 = arith.constant 0 : index
    %c0_31 = arith.constant 0 : index
    %32 = vector.load %arg3[%c1_29, %c0_30, %c0_31] : memref<3x12x4xbf16, #tpu.memory_space<vmem>>, vector<1x12x4xbf16>
    %33 = vector.shape_cast %32 : vector<1x12x4xbf16> to vector<12x4xbf16>
    %cst_32 = arith.constant dense<0.000000e+00> : vector<256x4xf32>
    %34 = tpu.matmul %28, %33, %cst_32 {dimension_numbers = #tpu.dot_dimension_numbers<[1], [0], [0], [1], [0, 0, 1, 1], [], []>} : vector<256x12xbf16>, vector<12x4xbf16>, vector<256x4xf32> -> vector<256x4xf32>
    %c2_33 = arith.constant 2 : index
    %c0_34 = arith.constant 0 : index
    %c0_35 = arith.constant 0 : index
    %35 = vector.load %arg3[%c2_33, %c0_34, %c0_35] : memref<3x12x4xbf16, #tpu.memory_space<vmem>>, vector<1x12x4xbf16>
    %36 = vector.shape_cast %35 : vector<1x12x4xbf16> to vector<12x4xbf16>
    %cst_36 = arith.constant dense<0.000000e+00> : vector<256x4xf32>
    %37 = tpu.matmul %28, %36, %cst_36 {dimension_numbers = #tpu.dot_dimension_numbers<[1], [0], [0], [1], [0, 0, 1, 1], [], []>} : vector<256x12xbf16>, vector<12x4xbf16>, vector<256x4xf32> -> vector<256x4xf32>
    %38 = tpu.iota {dimensions = array<i32: 1>} : vector<16x16x4xi32>
    %39 = vector.shape_cast %38 : vector<16x16x4xi32> to vector<256x4xi32>
    %c1_i32 = arith.constant 1 : i32
    %40 = vector.broadcast %c1_i32 : i32 to vector<256x4xi32>
    %41 = arith.cmpi sge, %39, %40 : vector<256x4xi32>
    %c1_i32_37 = arith.constant 1 : i32
    %42 = tpu.dynamic_rotate %31 by %c1_i32_37 dim 0 : vector<256x4xf32>, i32 -> vector<256x4xf32>
    %cst_38 = arith.constant 0.000000e+00 : f32
    %43 = vector.broadcast %cst_38 : f32 to vector<256x4xf32>
    %44 = arith.select %41, %42, %43 : vector<256x4xi1>, vector<256x4xf32>
    %45 = arith.addf %34, %44 : vector<256x4xf32>
    %c14_i32 = arith.constant 14 : i32
    %46 = vector.broadcast %c14_i32 : i32 to vector<256x4xi32>
    %47 = arith.cmpi sle, %39, %46 : vector<256x4xi32>
    %c255_i32 = arith.constant 255 : i32
    %48 = tpu.dynamic_rotate %37 by %c255_i32 dim 0 : vector<256x4xf32>, i32 -> vector<256x4xf32>
    %cst_39 = arith.constant 0.000000e+00 : f32
    %49 = vector.broadcast %cst_39 : f32 to vector<256x4xf32>
    %50 = arith.select %47, %48, %49 : vector<256x4xi1>, vector<256x4xf32>
    %51 = arith.addf %45, %50 : vector<256x4xf32>
    %c0_40 = arith.constant 0 : index
    %c0_41 = arith.constant 0 : index
    %52 = vector.load %arg6[%c0_40, %c0_41] : memref<1x4xf32, #tpu.memory_space<vmem>>, vector<1x4xf32>
    %53 = vector.broadcast %52 : vector<1x4xf32> to vector<256x4xf32>
    %54 = arith.addf %51, %53 : vector<256x4xf32>
    %cst_42 = arith.constant 0.000000e+00 : f32
    %55 = vector.broadcast %cst_42 : f32 to vector<256x4xf32>
    %56 = arith.maximumf %54, %55 : vector<256x4xf32>
    %57 = arith.truncf %56 : vector<256x4xf32> to vector<256x4xbf16>
    %58 = tpu.concatenate %57, %3 in 1 : vector<256x4xbf16>, vector<256x4xbf16> -> vector<256x8xbf16>
    %c0_43 = arith.constant 0 : index
    %c0_44 = arith.constant 0 : index
    %59 = vector.load %arg4[%c0_43, %c0_44] : memref<8x16xbf16, #tpu.memory_space<vmem>>, vector<8x16xbf16>
    %cst_45 = arith.constant dense<0.000000e+00> : vector<256x16xf32>
    %60 = tpu.matmul %58, %59, %cst_45 {dimension_numbers = #tpu.dot_dimension_numbers<[1], [0], [0], [1], [0, 0, 1, 1], [], []>} : vector<256x8xbf16>, vector<8x16xbf16>, vector<256x16xf32> -> vector<256x16xf32>
    %c0_46 = arith.constant 0 : index
    %c0_47 = arith.constant 0 : index
    %61 = vector.load %arg7[%c0_46, %c0_47] : memref<1x16xf32, #tpu.memory_space<vmem>>, vector<1x16xf32>
    %62 = vector.broadcast %61 : vector<1x16xf32> to vector<256x16xf32>
    %63 = arith.addf %60, %62 : vector<256x16xf32>
    %cst_48 = arith.constant 0.000000e+00 : f32
    %64 = vector.broadcast %cst_48 : f32 to vector<256x16xf32>
    %65 = arith.maximumf %63, %64 : vector<256x16xf32>
    %66 = vector.shape_cast %65 : vector<256x16xf32> to vector<16x16x16xf32>
    %c0_49 = arith.constant 0 : index
    %c0_50 = arith.constant 0 : index
    %c0_51 = arith.constant 0 : index
    %c0_52 = arith.constant 0 : index
    %67 = vector.load %arg8[%c0_49, %c0_50, %c0_51, %c0_52] : memref<1x16x16x16xf32, #tpu.memory_space<vmem>>, vector<1x16x16x16xf32>
    %68 = vector.shape_cast %67 : vector<1x16x16x16xf32> to vector<16x16x16xf32>
    %69 = vector.shape_cast %66 : vector<16x16x16xf32> to vector<1x16x16x16xf32>
    tpu.vector_store %arg8[%c0_49, %c0_50, %c0_51, %c0_52], %69 {strides = array<i32>} : memref<1x16x16x16xf32, #tpu.memory_space<vmem>>, vector<1x16x16x16xf32>,
    return
  }
  func.func @transform_0(%arg0: i32) -> (i32, i32, i32, i32) {
    %c0_i32 = arith.constant 0 : i32
    %c0_i32_0 = arith.constant 0 : i32
    %c0_i32_1 = arith.constant 0 : i32
    %c0_i32_2 = arith.constant 0 : i32
    return %arg0, %c0_i32, %c0_i32_0, %c0_i32_1 : i32, i32, i32, i32
  }
  func.func @transform_1(%arg0: i32) -> (i32, i32) {
    %c0_i32 = arith.constant 0 : i32
    %c0_i32_0 = arith.constant 0 : i32
    %c0_i32_1 = arith.constant 0 : i32
    return %c0_i32, %c0_i32_0 : i32, i32
  }
  func.func @transform_2(%arg0: i32) -> (i32, i32, i32) {
    %c0_i32 = arith.constant 0 : i32
    %c0_i32_0 = arith.constant 0 : i32
    %c0_i32_1 = arith.constant 0 : i32
    %c0_i32_2 = arith.constant 0 : i32
    return %c0_i32, %c0_i32_0, %c0_i32_1 : i32, i32, i32
  }
  func.func @transform_3(%arg0: i32) -> (i32, i32) {
    %c0_i32 = arith.constant 0 : i32
    %c0_i32_0 = arith.constant 0 : i32
    %c0_i32_1 = arith.constant 0 : i32
    return %c0_i32, %c0_i32_0 : i32, i32
  }
  func.func @transform_4(%arg0: i32) -> (i32, i32) {
    %c0_i32 = arith.constant 0 : i32
    %c0_i32_0 = arith.constant 0 : i32
    %c0_i32_1 = arith.constant 0 : i32
    return %c0_i32, %c0_i32_0 : i32, i32
  }
  func.func @transform_5(%arg0: i32) -> (i32, i32) {
    %c0_i32 = arith.constant 0 : i32
    %c0_i32_0 = arith.constant 0 : i32
    %c0_i32_1 = arith.constant 0 : i32
    return %c0_i32, %c0_i32_0 : i32, i32
  }
  func.func @transform_6(%arg0: i32) -> (i32, i32) {
    %c0_i32 = arith.constant 0 : i32
    %c0_i32_0 = arith.constant 0 : i32
    %c0_i32_1 = arith.constant 0 : i32
    return %c0_i32, %c0_i32_0 : i32, i32
  }
  func.func @transform_7(%arg0: i32) -> (i32, i32, i32, i32) {
    %c0_i32 = arith.constant 0 : i32
    %c0_i32_0 = arith.constant 0 : i32
    %c0_i32_1 = arith.constant 0 : i32
    %c0_i32_2 = arith.constant 0 : i32
    return %arg0, %c0_i32, %c0_i32_0, %c0_i32_1 : i32, i32, i32, i32
  }
}

</mosaic_0001>

<bundles_post_ra>
// kernel: tpu_custom_call.1
= control target key start
LH: loop header
LB: loop body
LE: loop exit
PB: predicated region body
PF: predicated region fallthrough
CT: control target
= control target key end

     0   :  { %12 = vsyncpa [#allocation4], 0  ;;  %s3785_s0 = inlined_call_operand.vmem [shape: f32[2,16,16,4], index: 0, kind: input, shape index: {}]   ;;  %s3786_s1 = inlined_call_operand.vmem [shape: bf16[4,4], index: 1, kind: input, shape index: {}]   ;;  %s3787_s2 = inlined_call_operand.vmem [shape: bf16[3,12,4], index: 2, kind: input, shape index: {}]   ;;  %s3788_s3 = inlined_call_operand.vmem [shape: bf16[8,16], index: 3, kind: input, shape index: {}]   ;;  %s3789_s4 = inlined_call_operand.vmem [shape: f32[1,4], index: 4, kind: input, shape index: {}]   ;;  %s3790_s5 = inlined_call_operand.vmem [shape: f32[1,4], index: 5, kind: input, shape index: {}]   ;;  %s3791_s6 = inlined_call_operand.vmem [shape: f32[1,16], index: 6, kind: input, shape index: {}]   ;;  %s3792_s7 = inlined_call_operand.hbm [shape: f32[2,16,16,16], index: 7, kind: output, shape index: {}]  }
   0x1   :  { %14 = vsyncpa [#allocation4 + $0x1], 0  ;;  %s2675_s24 = smov 0   ;;  %s2677_s25 = smov 0  }
   0x2   :  { %s2679_s26 = smov 0   ;;  %s2681_s27 = smov 0  }
   0x3 LB: > { %s2696_s28 = sadd.s32 4294967295, %s2628_s27   ;;  %s2153_s29 = sadd.s32 4294967294, %s2628_s27   ;;  %s2628_s27 = sphi %s2681_s27, %s3830_s27   ;;  %s2624_s26 = sphi %s2679_s26, %s3829_s26   ;;  %s2620_s25 = sphi %s2677_s25, %s3828_s25   ;;  %s2616_s24 = sphi %s2675_s24, %s3827_s24  }
   0x4   : > { %s2700_s30 = sadd.s32 1, %s2628_s27   ;;  %s179_s8 = sadd.s32 1, %s2624_s26 }
   0x5   : > { %s176_s9 = ssub.s32 %s2628_s27, %s2700_s30  ;;  %p189_p0 = scmp.ne.s32.totalorder %s2624_s26, %s2620_s25 }
   0x6   : > { %p177_p1 = scmp.eq.s32.totalorder %s176_s9, 0  ;;  %p190_p2 = scmp.eq.s32.totalorder %s2696_s28, 1 }
   0x7   : > { %p195_p3 = scmp.ne.s32.totalorder %s2620_s25, %s2616_s24  ;;  %p196_p4 = scmp.eq.s32.totalorder %s2153_s29, 1 }
   0x8   : > { %s2711_s10 = scalar_select %p177_p1, %s2624_s26, %s179_s8  }
   0x9   : > { %p2713_p5 = por %p190_p2, %p189_p0  ;;  %p2717_p6 = por %p196_p4, %p195_p3 }
   0xa   : > { %p2156_p7 = scmp.ge.s32.totalorder %s2628_s27, 1  ;;  %p240_p8 = scmp.lt.s32.totalorder %s2628_s27, 3 }
   0xc   : > { %p241_p9 = pnand %p2156_p7, %p240_p8 }
   0xe   : > { %244 = sbr.rel (%p241_p9) target bundleno = 965 (0x3c5), region = 48 }
  0x15   : > { %v326_v0 = vld [vmem:[%s3786_s1] sm:$0x3]  ;;  %vm383_vm0 = vcmask 1041408   ;;  %p272_p10 = scmp.lt.s32.totalorder %s2696_s28, 1  ;;  %vm334_vm1 = vcmask 31744   ;;  %v2630_v50 = vmov 0  }
  0x16   : > { %2514 = vmatprep.subr.msk.bf16.mxu0 %vm383_vm0, %v326_v0  ;;  %v385_v1 = vsel %vm383_vm0, %v326_v0, 0  ;;  %2515 = vmatprep.subr.msk.bf16.mxu1 %vm383_vm0, %v326_v0  ;;  %580 = vst.msk [vmem:[#allocation2] sm:$0xff] %vm334_vm1, %v2630_v50  ;;  %582 = vst.msk [vmem:[#allocation2 + $0x88] sm:$0xff] %vm334_vm1, %v2630_v50  ;;  %v2563_v51 = vld [vmem:[%s3787_s2] sm:$0x3f]   ;;  %vm882_vm2 = vcmask 1045504  }
  0x17   : > { %2343 = vmatpush3.bf16.msra.mxu0 %v385_v1  ;;  %s273_s15 = scalar_select %p272_p10, %s2696_s28, 1  ;;  %2513 = vmatpush3.bf16.msra.mxu1 %v385_v1  ;;  %v884_v52 = vsel %vm882_vm2, %v2563_v51, 0  ;;  %v2839_v53 = vld [vmem:[%s3789_s4] ss:$0 sm:$0xff]  ;;  %vm809_vm3 = vcmask 64512   ;;  %vm849_vm4 = vcmask 97280  }
  0x18   : > { %2516 = vmatprep.subr.msk.bf16.mxu1 %vm882_vm2, %v2563_v51  ;;  %s2631_s14 = smov 8   ;;  %vm1847_vm5 = vcmask 1043456   ;;  %s269_s20 = sand.u32 1, %s2620_s25   ;;  %vm2044_vm10 = vcmask 130048  }
  0x19   : > { %s2255_s16 = sshll.u32 %s273_s15, 8  ;;  %s2632_s15 = smov 4  }
  0x1a   : > { %s2731_s19 = scalar_lea.vmem %s3785_s0, %s2255_s16  ;;  %s2157_s23 = sshll.u32 %s269_s20, 8 }
  0x1b   : > { %v278_v2 = vld [vmem:[%s2731_s19] sm:$0xff]  ;;  %v279_v3 = vld [vmem:[%s2731_s19 + $0x8] sm:$0xff]  ;;  %v280_v4 = vld [vmem:[%s2731_s19 + $0x10] sm:$0xff]  ;;  %s3638_s29 = scalar_lea.vmem [#allocation3], %s2157_s23  ;;  %s2256_s8 = sshll.u32 %s2696_s28, 12 }
  0x1c   : > { %v2736_v5 = vpack.c.bf16 %v279_v3, %v278_v2  ;;  %v281_v6 = vld [vmem:[%s2731_s19 + $0x18] sm:$0xff]  ;;  %v282_v7 = vld [vmem:[%s2731_s19 + $0x20] sm:$0xff]  ;;  %v283_v8 = vld [vmem:[%s2731_s19 + $0x28] sm:$0xff]  ;;  %s2091_s9 = sshll.u32 %s3638_s29, 4  ;;  %s3731_s16 = scalar_lea.hbm %s3792_s7, %s2256_s8  ;;  %s3735_s9 = int_to_ptr.vmem [resolvable:$true] %s2091_s9 }
  0x1d   : > { %v2741_v9 = vpack.c.bf16 %v281_v6, %v280_v4  ;;  %v2743_v10 = vpack.c.bf16 %v283_v8, %v282_v7  ;;  %v284_v11 = vld [vmem:[%s2731_s19 + $0x30] sm:$0xff]  ;;  %v285_v12 = vld [vmem:[%s2731_s19 + $0x38] sm:$0xff]  ;;  %v286_v13 = vld [vmem:[%s2731_s19 + $0x40] sm:$0xff]  ;;  %s3743_s28 = scalar_lea.sflag [#allocation4], %s269_s20  ;;  %s2566_s17 = scalar_lea.vmem %s3735_s9, 4096 }
  0x1e   : > { %2344 = vmatprep.mubr.msk.bf16.mxu0 %vm334_vm1, %v2736_v5  ;;  %v287_v14 = vld [vmem:[%s2731_s19 + $0x48] sm:$0xff]  ;;  %v294_v15 = vld [vmem:[%s2731_s19 + $0x80] sm:$0xff]  ;;  %v296_v18 = vld [vmem:[%s2731_s19 + $0x90] sm:$0xff]  ;;  %v2765_v23 = vpack.c.bf16 %v285_v12, %v284_v11  ;;  %p2567_p11 = scmp.ne.s32.totalorder %s3735_s9, %s2566_s17  ;;  %s2633_s18 = smov [#allocation3]  }
  0x1f   : > { %2345 = vmatmul.mubr.msk.bf16.vlgmr.msra.gmra.mrb[0].mxu0 %vm334_vm1, %v2741_v9  ;;  %v295_v16 = vld [vmem:[%s2731_s19 + $0x88] sm:$0xff]  ;;  %v297_v19 = vld [vmem:[%s2731_s19 + $0x98] sm:$0xff]  ;;  %v298_v20 = vld [vmem:[%s2731_s19 + $0xa0] sm:$0xff]  ;;  %v2771_v25 = vpack.c.bf16 %v287_v14, %v286_v13 }
  0x20   : > { %2348 = vmatprep.mubr.msk.bf16.mxu0 %vm334_vm1, %v2743_v10  ;;  %v2757_v17 = vpack.c.bf16 %v295_v16, %v294_v15  ;;  %v2762_v21 = vpack.c.bf16 %v297_v19, %v296_v18  ;;  %v299_v22 = vld [vmem:[%s2731_s19 + $0xa8] sm:$0xff]  ;;  %v300_v26 = vld [vmem:[%s2731_s19 + $0xb0] sm:$0xff]  ;;  %v301_v27 = vld [vmem:[%s2731_s19 + $0xb8] sm:$0xff]  ;;  %p2568_p12 = pnand %p2567_p11, %p2713_p5 }
  0x21   : > { %v2769_v24 = vpack.c.bf16 %v299_v22, %v298_v20  ;;  %v302_v28 = vld [vmem:[%s2731_s19 + $0xc0] sm:$0xff]  ;;  %v303_v29 = vld [vmem:[%s2731_s19 + $0xc8] sm:$0xff]  ;;  %v288_v30 = vld [vmem:[%s2731_s19 + $0x50] sm:$0xff]  ;;  %v2787_v32 = vpack.c.bf16 %v301_v27, %v300_v26 }
  0x22   : > { %2360 = vmatprep.mubr.msk.bf16.mxu1 %vm334_vm1, %v2757_v17  ;;  %v289_v31 = vld [vmem:[%s2731_s19 + $0x58] sm:$0xff]  ;;  %v290_v33 = vld [vmem:[%s2731_s19 + $0x60] sm:$0xff]  ;;  %v291_v34 = vld [vmem:[%s2731_s19 + $0x68] sm:$0xff]  ;;  %v2791_v35 = vpack.c.bf16 %v303_v29, %v302_v28  ;;  %p2569_p13 = pneg %p2568_p12 }
  0x23   : > { %2361 = vmatmul.mubr.msk.bf16.vlgmr.msra.gmra.mrb[0].mxu1 %vm334_vm1, %v2762_v21  ;;  %v2793_v36 = vpack.c.bf16 %v289_v31, %v288_v30  ;;  %v2795_v37 = vpack.c.bf16 %v291_v34, %v290_v33  ;;  %v304_v38 = vld [vmem:[%s2731_s19 + $0xd0] sm:$0xff]  ;;  %v305_v39 = vld [vmem:[%s2731_s19 + $0xd8] sm:$0xff]  ;;  %v306_v40 = vld [vmem:[%s2731_s19 + $0xe0] sm:$0xff] }
  0x24   : > { %2364 = vmatprep.mubr.msk.bf16.mxu1 %vm334_vm1, %v2769_v24  ;;  %v307_v41 = vld [vmem:[%s2731_s19 + $0xe8] sm:$0xff]  ;;  %v292_v42 = vld [vmem:[%s2731_s19 + $0x70] sm:$0xff]  ;;  %v293_v43 = vld [vmem:[%s2731_s19 + $0x78] sm:$0xff]  ;;  %v2811_v44 = vpack.c.bf16 %v305_v39, %v304_v38  ;;  %2377 = vmatpush3.bf16.msra.mxu1 %v884_v52 }
  0x25   : > { %v2813_v45 = vpack.c.bf16 %v307_v41, %v306_v40  ;;  %v2815_v46 = vpack.c.bf16 %v293_v43, %v292_v42  ;;  %v308_v47 = vld [vmem:[%s2731_s19 + $0xf0] sm:$0xff]  ;;  %v309_v48 = vld [vmem:[%s2731_s19 + $0xf8] sm:$0xff]  ;;  %v2565_v43 = vld [vmem:[%s3787_s2 + $0x8] sm:$0x3f]   ;;  %s2570_s19 = sshll.u32 %s2633_s18, 4  ;;  %s2571_s19 = int_to_ptr.vmem [resolvable:$false] %s2570_s19 }
  0x26   : > { %v2825_v49 = vpack.c.bf16 %v309_v48, %v308_v47  ;;  %v2564_v16 = vld [vmem:[%s3787_s2 + $0x10] sm:$0x3f]   ;;  %2518 = vmatprep.subr.msk.bf16.mxu1 %vm882_vm2, %v2565_v43  ;;  %s2572_s21 = scalar_lea.vmem %s2571_s19, 8192  ;;  %p2573_p0 = scmp.lt.s32.totalorder %s3735_s9, %s2571_s19 }
  0x27   : > { %2349 = vmatmul.mubr.msk.bf16.gmra.mrb[4].mxu0 %vm334_vm1, %v2765_v23  ;;  %2517 = vmatprep.subr.msk.bf16.mxu0 %vm882_vm2, %v2564_v16  ;;  %v1059_v29 = vsel %vm882_vm2, %v2564_v16, 0  ;;  %p2574_p1 = scmp.lt.s32.totalorder %s2572_s21, %s2566_s17 }
  0x28   : > { %2352 = vmatprep.mubr.msk.bf16.mxu0 %vm334_vm1, %v2771_v25  ;;  %2411 = vmatpush3.bf16.msra.mxu0 %v1059_v29 }
  0x29   : > { %p2575_p2 = por %p2574_p1, %p2573_p0 }
  0x2b   : > { %2365 = vmatmul.mubr.msk.bf16.gmra.mrb[4].mxu1 %vm334_vm1, %v2787_v32  ;;  %p2576_p3 = pnand %p2575_p2, %p2569_p13 }
  0x2c   : > { %2368 = vmatprep.mubr.msk.bf16.mxu1 %vm334_vm1, %v2791_v35 }
  0x2f   : > { %2353 = vmatmul.mubr.msk.bf16.gmra.mrb[8].mxu0 %vm334_vm1, %v2793_v36 }
  0x30   : > { %2356 = vmatprep.mubr.msk.bf16.mxu0 %vm334_vm1, %v2795_v37 }
  0x33   : > { %2369 = vmatmul.mubr.msk.bf16.gmra.mrb[8].mxu1 %vm334_vm1, %v2811_v44 }
  0x34   : > { %2372 = vmatprep.mubr.msk.bf16.mxu1 %vm334_vm1, %v2813_v45 }
  0x37   : > { %2357 = vmatmul.mubr.msk.bf16.gmra.mrb[12].mxu0 %vm334_vm1, %v2815_v46 }
  0x3b   : > { %2373 = vmatmul.mubr.msk.bf16.gmra.mrb[12].mxu1 %vm334_vm1, %v2825_v49 }
  0xf2   : > { %v2346_v54 = vpop.f32.mrb[0].mxu0 }
  0xf3   : > { %v430_v55 = vadd.f32 %v2346_v54, %v2839_v53  ;;  %v421_v56 = vpop.f32.mrb[1].mxu0 }
  0xf4   : > { %v422_v57 = vadd.f32 %v2839_v53, %v421_v56  ;;  %v2347_v58 = vpop.f32.mrb[2].mxu0  ;;  %v2869_v56 = vsel %vm882_vm2, %v2565_v43, 0 }
  0xf5   : > { %v433_v59 = vadd.f32 %v2347_v58, %v2839_v53  ;;  %v424_v60 = vpop.f32.mrb[3].mxu0  ;;  %v550_v62 = vmax.f32 %v430_v55, 0.0 }
  0xf6   : > { %v425_v61 = vadd.f32 %v2839_v53, %v424_v60  ;;  %v2362_v0 = vpop.f32.mrb[0].mxu1  ;;  %v548_v1 = vmax.f32 %v422_v57, 0.0 }
  0xf7   : > { %v551_v63 = vmax.f32 %v433_v59, 0.0  ;;  %v494_v3 = vadd.f32 %v2362_v0, %v2839_v53  ;;  %v485_v4 = vpop.f32.mrb[1].mxu1 }
  0xf8   : > { %v549_v2 = vmax.f32 %v425_v61, 0.0  ;;  %v486_v7 = vadd.f32 %v2839_v53, %v485_v4  ;;  %v2363_v8 = vpop.f32.mrb[2].mxu1 }
  0xf9   : > { %v584_v6 = vpack.c.bf16 %v551_v63, %v550_v62  ;;  %v566_v13 = vmax.f32 %v494_v3, 0.0  ;;  %v497_v14 = vadd.f32 %v2363_v8, %v2839_v53  ;;  %v488_v15 = vpop.f32.mrb[3].mxu1 }
  0xfa   : > { %v583_v11 = vpack.c.bf16 %v549_v2, %v548_v1  ;;  %v2350_v12 = vpop.f32.mrb[4].mxu0  ;;  %v564_v20 = vmax.f32 %v486_v7, 0.0  ;;  %v489_v22 = vadd.f32 %v2839_v53, %v488_v15 }
  0xfb   : > { %601 = vst.msk [vmem:[#allocation2 + $0x10] sm:$0xff] %vm334_vm1, %v584_v6  ;;  %v446_v18 = vadd.f32 %v2350_v12, %v2839_v53  ;;  %v437_v19 = vpop.f32.mrb[5].mxu0  ;;  %v567_v28 = vmax.f32 %v497_v14, 0.0 }
  0xfc   : > { %600 = vst.msk [vmem:[#allocation2 + $0x8] sm:$0xff] %vm334_vm1, %v583_v11  ;;  %v438_v26 = vadd.f32 %v2839_v53, %v437_v19  ;;  %v2351_v27 = vpop.f32.mrb[6].mxu0  ;;  %v565_v33 = vmax.f32 %v489_v22, 0.0 }
  0xfd   : > { %v449_v30 = vadd.f32 %v2351_v27, %v2839_v53  ;;  %v440_v31 = vpop.f32.mrb[7].mxu0  ;;  %v592_v38 = vpack.c.bf16 %v567_v28, %v566_v13  ;;  %v554_v39 = vmax.f32 %v446_v18, 0.0 }
  0xfe   : > { %v441_v34 = vadd.f32 %v2839_v53, %v440_v31  ;;  %v591_v41 = vpack.c.bf16 %v565_v33, %v564_v20  ;;  %v2366_v42 = vpop.f32.mrb[4].mxu1  ;;  %v552_v47 = vmax.f32 %v438_v26, 0.0 }
  0xff   : > { %v555_v40 = vmax.f32 %v449_v30, 0.0  ;;  %609 = vst.msk [vmem:[#allocation2 + $0x50] sm:$0xff] %vm334_vm1, %v592_v38  ;;  %v510_v50 = vadd.f32 %v2366_v42, %v2839_v53  ;;  %v501_v51 = vpop.f32.mrb[5].mxu1 }
 0x100   : > { %v553_v48 = vmax.f32 %v441_v34, 0.0  ;;  %608 = vst.msk [vmem:[#allocation2 + $0x48] sm:$0xff] %vm334_vm1, %v591_v41  ;;  %v502_v54 = vadd.f32 %v2839_v53, %v501_v51  ;;  %v2367_v55 = vpop.f32.mrb[6].mxu1 }
 0x101   : > { %v586_v52 = vpack.c.bf16 %v555_v40, %v554_v39  ;;  %v570_v60 = vmax.f32 %v510_v50, 0.0  ;;  %v513_v61 = vadd.f32 %v2367_v55, %v2839_v53  ;;  %v504_v62 = vpop.f32.mrb[7].mxu1 }
 0x102   : > { %v585_v57 = vpack.c.bf16 %v553_v48, %v552_v47  ;;  %v2354_v58 = vpop.f32.mrb[8].mxu0  ;;  %v2871_v59 = vld [vmem:[#allocation2 + $0x10] sm:$0xff]  ;;  %v568_v2 = vmax.f32 %v502_v54, 0.0  ;;  %v505_v3 = vadd.f32 %v2839_v53, %v504_v62 }
 0x103   : > { %603 = vst.msk [vmem:[#allocation2 + $0x20] sm:$0xff] %vm334_vm1, %v586_v52  ;;  %v462_v63 = vadd.f32 %v2354_v58, %v2839_v53  ;;  %729 = vrot.lane.b32.xlu1 %v2871_v59, %s2631_s14  ;;  %v453_v0 = vpop.f32.mrb[9].mxu0  ;;  %v2878_v1 = vld [vmem:[#allocation2 + $0x8] sm:$0xff]  ;;  %v571_v7 = vmax.f32 %v513_v61, 0.0 }
 0x104   : > { %602 = vst.msk [vmem:[#allocation2 + $0x18] sm:$0xff] %vm334_vm1, %v585_v57  ;;  %v454_v4 = vadd.f32 %v2839_v53, %v453_v0  ;;  %v2355_v6 = vpop.f32.mrb[10].mxu0  ;;  %681 = vrot.lane.b32.xlu0 %v2878_v1, %s2632_s15  ;;  %v569_v12 = vmax.f32 %v505_v3, 0.0 }
 0x105   : > { %v465_v8 = vadd.f32 %v2355_v6, %v2839_v53  ;;  %v456_v11 = vpop.f32.mrb[11].mxu0  ;;  %v594_v14 = vpack.c.bf16 %v571_v7, %v570_v60  ;;  %v558_v15 = vmax.f32 %v462_v63, 0.0 }
 0x106   : > { %v457_v13 = vadd.f32 %v2839_v53, %v456_v11  ;;  %v593_v18 = vpack.c.bf16 %v569_v12, %v568_v2  ;;  %v2370_v19 = vpop.f32.mrb[8].mxu1  ;;  %v556_v20 = vmax.f32 %v454_v4, 0.0 }
 0x107   : > { %v559_v16 = vmax.f32 %v465_v8, 0.0  ;;  %611 = vst.msk [vmem:[#allocation2 + $0x60] sm:$0xff] %vm334_vm1, %v594_v14  ;;  %v526_v26 = vadd.f32 %v2370_v19, %v2839_v53  ;;  %v517_v27 = vpop.f32.mrb[9].mxu1 }
 0x108   : > { %v557_v22 = vmax.f32 %v457_v13, 0.0  ;;  %683 = vrot.lane.b32.xlu0 %v2871_v59, %s2632_s15  ;;  %610 = vst.msk [vmem:[#allocation2 + $0x58] sm:$0xff] %vm334_vm1, %v593_v18  ;;  %v518_v29 = vadd.f32 %v2839_v53, %v517_v27  ;;  %v2371_v30 = vpop.f32.mrb[10].mxu1 }
 0x109   : > { %v588_v28 = vpack.c.bf16 %v559_v16, %v558_v15  ;;  %v574_v34 = vmax.f32 %v526_v26, 0.0  ;;  %v529_v38 = vadd.f32 %v2371_v30, %v2839_v53  ;;  %v520_v39 = vpop.f32.mrb[11].mxu1  ;;  %v2947_v30 = vld [vmem:[#allocation2 + $0x48] sm:$0xff] }
 0x10a   : > { %v587_v31 = vpack.c.bf16 %v557_v22, %v556_v20  ;;  %v2358_v33 = vpop.f32.mrb[12].mxu0  ;;  %v572_v43 = vmax.f32 %v518_v29, 0.0  ;;  %v521_v47 = vadd.f32 %v2839_v53, %v520_v39  ;;  %v2907_v62 = vld [vmem:[#allocation2 + $0x20] sm:$0xff] }
 0x10b   : > { %605 = vst.msk [vmem:[#allocation2 + $0x30] sm:$0xff] %vm334_vm1, %v588_v28  ;;  %v478_v40 = vadd.f32 %v2358_v33, %v2839_v53  ;;  %v469_v41 = vpop.f32.mrb[13].mxu0  ;;  %v2896_v42 = vld [vmem:[#allocation2 + $0x18] sm:$0xff]  ;;  %v575_v51 = vmax.f32 %v529_v38, 0.0 }
 0x10c   : > { %604 = vst.msk [vmem:[#allocation2 + $0x28] sm:$0xff] %vm334_vm1, %v587_v31  ;;  %v470_v48 = vadd.f32 %v2839_v53, %v469_v41  ;;  %v2359_v50 = vpop.f32.mrb[14].mxu0  ;;  %731 = vrot.lane.b32.xlu1 %v2896_v42, %s2631_s14  ;;  %685 = vrot.lane.b32.xlu0 %v2896_v42, %s2632_s15  ;;  %v573_v55 = vmax.f32 %v521_v47, 0.0  ;;  %v2953_v31 = vld [vmem:[#allocation2 + $0x50] sm:$0xff] }
 0x10d   : > { %v481_v52 = vadd.f32 %v2359_v50, %v2839_v53  ;;  %v472_v54 = vpop.f32.mrb[15].mxu0  ;;  %v596_v58 = vpack.c.bf16 %v575_v51, %v574_v34  ;;  %v562_v60 = vmax.f32 %v478_v40, 0.0 }
 0x10e   : > { %v473_v57 = vadd.f32 %v2839_v53, %v472_v54  ;;  %v595_v63 = vpack.c.bf16 %v573_v55, %v572_v43  ;;  %v2374_v0 = vpop.f32.mrb[12].mxu1  ;;  %v560_v2 = vmax.f32 %v470_v48, 0.0  ;;  %v2965_v34 = vld [vmem:[#allocation2 + $0x60] sm:$0xff]  ;;  %v664_v43 = vld [vmem:[#allocation2 + $0x88] sm:$0xff] }
 0x10f   : > { %v563_v61 = vmax.f32 %v481_v52, 0.0  ;;  %613 = vst.msk [vmem:[#allocation2 + $0x70] sm:$0xff] %vm334_vm1, %v596_v58  ;;  %v542_v4 = vadd.f32 %v2374_v0, %v2839_v53  ;;  %v533_v6 = vpop.f32.mrb[13].mxu1  ;;  %v2959_v33 = vld [vmem:[#allocation2 + $0x58] sm:$0xff] }
 0x110   : > { %v561_v3 = vmax.f32 %v473_v57, 0.0  ;;  %687 = vrot.lane.b32.xlu1 %v2907_v62, %s2632_s15  ;;  %733 = vrot.lane.b32.xlu0 %v2907_v62, %s2631_s14  ;;  %612 = vst.msk [vmem:[#allocation2 + $0x68] sm:$0xff] %vm334_vm1, %v595_v63  ;;  %v534_v8 = vadd.f32 %v2839_v53, %v533_v6  ;;  %v2375_v11 = vpop.f32.mrb[14].mxu1 }
 0x111   : > { %v590_v7 = vpack.c.bf16 %v563_v61, %v562_v60  ;;  %v578_v13 = vmax.f32 %v542_v4, 0.0  ;;  %v545_v14 = vadd.f32 %v2375_v11, %v2839_v53  ;;  %v536_v15 = vpop.f32.mrb[15].mxu1 }
 0x112   : > { %v589_v12 = vpack.c.bf16 %v561_v3, %v560_v2  ;;  %v576_v18 = vmax.f32 %v534_v8, 0.0  ;;  %v537_v19 = vadd.f32 %v2839_v53, %v536_v15  ;;  %v2927_v27 = vld [vmem:[#allocation2 + $0x30] sm:$0xff] }
 0x113   : > { %607 = vst.msk [vmem:[#allocation2 + $0x40] sm:$0xff] %vm334_vm1, %v590_v7  ;;  %v2919_v16 = vld [vmem:[#allocation2 + $0x28] sm:$0xff]  ;;  %v579_v20 = vmax.f32 %v545_v14, 0.0 }
 0x114   : > { %606 = vst.msk [vmem:[#allocation2 + $0x38] sm:$0xff] %vm334_vm1, %v589_v12  ;;  %735 = vrot.lane.b32.xlu1 %v2919_v16, %s2631_s14  ;;  %689 = vrot.lane.b32.xlu0 %v2919_v16, %s2632_s15  ;;  %v577_v22 = vmax.f32 %v537_v19, 0.0 }
 0x115   : > { %v598_v26 = vpack.c.bf16 %v579_v20, %v578_v13 }
 0x116   : > { %v597_v28 = vpack.c.bf16 %v577_v22, %v576_v18  ;;  %v2977_v39 = vld [vmem:[#allocation2 + $0x70] sm:$0xff] }
 0x117   : > { %615 = vst.msk [vmem:[#allocation2 + $0x80] sm:$0xff] %vm334_vm1, %v598_v26  ;;  %v2971_v38 = vld [vmem:[#allocation2 + $0x68] sm:$0xff] }
 0x118   : > { %691 = vrot.lane.b32.xlu1 %v2927_v27, %s2632_s15  ;;  %737 = vrot.lane.b32.xlu0 %v2927_v27, %s2631_s14  ;;  %614 = vst.msk [vmem:[#allocation2 + $0x78] sm:$0xff] %vm334_vm1, %v597_v28 }
 0x11a   : > { %v2941_v29 = vld [vmem:[#allocation2 + $0x40] sm:$0xff] }
 0x11b   : > { %v2935_v53 = vld [vmem:[#allocation2 + $0x38] sm:$0xff] }
 0x11c   : > { %739 = vrot.lane.b32.xlu1 %v2935_v53, %s2631_s14  ;;  %693 = vrot.lane.b32.xlu0 %v2935_v53, %s2632_s15 }
 0x11e   : > { %v647_v41 = vld [vmem:[#allocation2 + $0x80] sm:$0xff] }
 0x11f   : > { %v2983_v40 = vld [vmem:[#allocation2 + $0x78] sm:$0xff] }
 0x120   : > { %695 = vrot.lane.b32.xlu1 %v2941_v29, %s2632_s15  ;;  %741 = vrot.lane.b32.xlu0 %v2941_v29, %s2631_s14 }
 0x124   : > { %743 = vrot.lane.b32.xlu1 %v2947_v30, %s2631_s14  ;;  %697 = vrot.lane.b32.xlu0 %v2947_v30, %s2632_s15 }
 0x128   : > { %699 = vrot.lane.b32.xlu1 %v2953_v31, %s2632_s15  ;;  %745 = vrot.lane.b32.xlu0 %v2953_v31, %s2631_s14 }
 0x12c   : > { %747 = vrot.lane.b32.xlu1 %v2959_v33, %s2631_s14  ;;  %701 = vrot.lane.b32.xlu0 %v2959_v33, %s2632_s15 }
 0x130   : > { %703 = vrot.lane.b32.xlu1 %v2965_v34, %s2632_s15  ;;  %749 = vrot.lane.b32.xlu0 %v2965_v34, %s2631_s14 }
 0x134   : > { %751 = vrot.lane.b32.xlu1 %v2971_v38, %s2631_s14  ;;  %705 = vrot.lane.b32.xlu0 %v2971_v38, %s2632_s15 }
 0x138   : > { %707 = vrot.lane.b32.xlu1 %v2977_v39, %s2632_s15  ;;  %753 = vrot.lane.b32.xlu0 %v2977_v39, %s2631_s14 }
 0x13c   : > { %755 = vrot.lane.b32.xlu1 %v2983_v40, %s2631_s14  ;;  %709 = vrot.lane.b32.xlu0 %v2983_v40, %s2632_s15 }
 0x140   : > { %711 = vrot.lane.b32.xlu1 %v647_v41, %s2632_s15  ;;  %757 = vrot.lane.b32.xlu0 %v647_v41, %s2631_s14 }
 0x144   : > { %759 = vrot.lane.b32.xlu1 %v664_v43, %s2631_s14  ;;  %1727 = vrot.lane.b32.xlu0 %v2736_v5, %s2632_s15  ;;  %v616_v5 = vld [vmem:[#allocation2] sm:$0xff] }
 0x148   : > { %1729 = vrot.lane.b32.xlu1 %v2741_v9, %s2632_s15  ;;  %1731 = vrot.lane.b32.xlu0 %v2743_v10, %s2632_s15 }
 0x14c   : > { %1733 = vrot.lane.b32.xlu1 %v2765_v23, %s2632_s15  ;;  %1735 = vrot.lane.b32.xlu0 %v2771_v25, %s2632_s15 }
 0x150   : > { %1737 = vrot.lane.b32.xlu1 %v2793_v36, %s2632_s15  ;;  %1739 = vrot.lane.b32.xlu0 %v2795_v37, %s2632_s15 }
 0x154   : > { %1741 = vrot.lane.b32.xlu1 %v2815_v46, %s2632_s15  ;;  %1743 = vrot.lane.b32.xlu0 %v2757_v17, %s2632_s15 }
 0x158   : > { %1745 = vrot.lane.b32.xlu1 %v2762_v21, %s2632_s15  ;;  %1747 = vrot.lane.b32.xlu0 %v2769_v24, %s2632_s15 }
 0x15c   : > { %1749 = vrot.lane.b32.xlu1 %v2787_v32, %s2632_s15  ;;  %1751 = vrot.lane.b32.xlu0 %v2791_v35, %s2632_s15 }
 0x160   : > { %1753 = vrot.lane.b32.xlu1 %v2811_v44, %s2632_s15  ;;  %1755 = vrot.lane.b32.xlu0 %v2813_v45, %s2632_s15 }
 0x164   : > { %1757 = vrot.lane.b32.xlu1 %v2825_v49, %s2632_s15 }
 0x175   : > { %v730_v10 = vpop.permute.xlu1 %729 }
 0x176   : > { %v682_v9 = vpop.permute.xlu0 %681 }
 0x177   : > { %v763_v17 = vsel %vm334_vm1, %v616_v5, %v682_v9 }
 0x178   : > { %v3026_v21 = vsel %vm809_vm3, %v763_v17, %v730_v10  ;;  %v1222_v17 = vlaneseq }
 0x179   : > { %2378 = vmatprep.mubr.msk.bf16.mxu1 %vm849_vm4, %v3026_v21  ;;  %2412 = vmatprep.mubr.msk.bf16.mxu0 %vm849_vm4, %v3026_v21 }
 0x17a   : > { %v684_v23 = vpop.permute.xlu0 %683 }
 0x17b   : > { %v766_v24 = vsel %vm334_vm1, %v2878_v1, %v684_v23 }
 0x17e   : > { %v732_v25 = vpop.permute.xlu1 %731  ;;  %v686_v32 = vpop.permute.xlu0 %685 }
 0x17f   : > { %v3035_v35 = vsel %vm809_vm3, %v766_v24, %v732_v25  ;;  %v769_v36 = vsel %vm334_vm1, %v2871_v59, %v686_v32 }
 0x180   : > { %2379 = vmatmul.mubr.msk.bf16.vlgmr.msra.gmra.mrb[16].mxu1 %vm849_vm4, %v3035_v35  ;;  %2413 = vmatmul.mubr.msk.bf16.vlgmr.msra.gmra.mrb[16].mxu0 %vm849_vm4, %v3035_v35 }
 0x181   : > { %2445 = vmatpush3.bf16.msra.mxu1 %v2869_v56 }
 0x182   : > { %v688_v37 = vpop.permute.xlu1 %687  ;;  %v734_v44 = vpop.permute.xlu0 %733 }
 0x183   : > { %v3045_v45 = vsel %vm809_vm3, %v769_v36, %v734_v44  ;;  %v772_v46 = vsel %vm334_vm1, %v2896_v42, %v688_v37 }
 0x184   : > { %2382 = vmatprep.mubr.msk.bf16.mxu1 %vm849_vm4, %v3045_v45  ;;  %2416 = vmatprep.mubr.msk.bf16.mxu0 %vm849_vm4, %v3045_v45 }
 0x186   : > { %v736_v49 = vpop.permute.xlu1 %735  ;;  %v690_v1 = vpop.permute.xlu0 %689 }
 0x187   : > { %v3054_v56 = vsel %vm809_vm3, %v772_v46, %v736_v49  ;;  %v775_v59 = vsel %vm334_vm1, %v2907_v62, %v690_v1 }
 0x188   : > { %2383 = vmatmul.mubr.msk.bf16.gmra.mrb[20].mxu1 %vm849_vm4, %v3054_v56  ;;  %2417 = vmatmul.mubr.msk.bf16.gmra.mrb[20].mxu0 %vm849_vm4, %v3054_v56 }
 0x18a   : > { %v692_v47 = vpop.permute.xlu1 %691  ;;  %v738_v48 = vpop.permute.xlu0 %737 }
 0x18b   : > { %v3063_v50 = vsel %vm809_vm3, %v775_v59, %v738_v48  ;;  %v778_v42 = vsel %vm334_vm1, %v2919_v16, %v692_v47 }
 0x18c   : > { %2386 = vmatprep.mubr.msk.bf16.mxu1 %vm849_vm4, %v3063_v50  ;;  %2420 = vmatprep.mubr.msk.bf16.mxu0 %vm849_vm4, %v3063_v50 }
 0x18e   : > { %v740_v51 = vpop.permute.xlu1 %739  ;;  %v694_v52 = vpop.permute.xlu0 %693 }
 0x18f   : > { %v3072_v54 = vsel %vm809_vm3, %v778_v42, %v740_v51  ;;  %v781_v55 = vsel %vm334_vm1, %v2927_v27, %v694_v52 }
 0x190   : > { %2387 = vmatmul.mubr.msk.bf16.gmra.mrb[24].mxu1 %vm849_vm4, %v3072_v54  ;;  %2421 = vmatmul.mubr.msk.bf16.gmra.mrb[24].mxu0 %vm849_vm4, %v3072_v54 }
 0x192   : > { %v696_v57 = vpop.permute.xlu1 %695  ;;  %v742_v58 = vpop.permute.xlu0 %741 }
 0x193   : > { %v823_v60 = vsel %vm809_vm3, %v781_v55, %v742_v58  ;;  %v784_v61 = vsel %vm334_vm1, %v2935_v53, %v696_v57 }
 0x194   : > { %2390 = vmatprep.mubr.msk.bf16.mxu1 %vm849_vm4, %v823_v60  ;;  %2424 = vmatprep.mubr.msk.bf16.mxu0 %vm849_vm4, %v823_v60 }
 0x196   : > { %v744_v62 = vpop.permute.xlu1 %743  ;;  %v698_v63 = vpop.permute.xlu0 %697 }
 0x197   : > { %v825_v0 = vsel %vm809_vm3, %v784_v61, %v744_v62  ;;  %v787_v2 = vsel %vm334_vm1, %v2941_v29, %v698_v63 }
 0x198   : > { %2391 = vmatmul.mubr.msk.bf16.gmra.mrb[28].mxu1 %vm849_vm4, %v825_v0  ;;  %2425 = vmatmul.mubr.msk.bf16.gmra.mrb[28].mxu0 %vm849_vm4, %v825_v0 }
 0x19a   : > { %v700_v3 = vpop.permute.xlu1 %699  ;;  %v746_v4 = vpop.permute.xlu0 %745 }
 0x19b   : > { %v827_v6 = vsel %vm809_vm3, %v787_v2, %v746_v4  ;;  %v790_v7 = vsel %vm334_vm1, %v2947_v30, %v700_v3 }
 0x19c   : > { %2394 = vmatprep.mubr.msk.bf16.mxu1 %vm849_vm4, %v827_v6  ;;  %2428 = vmatprep.mubr.msk.bf16.mxu0 %vm849_vm4, %v827_v6 }
 0x19e   : > { %v748_v8 = vpop.permute.xlu1 %747  ;;  %v702_v11 = vpop.permute.xlu0 %701 }
 0x19f   : > { %v829_v12 = vsel %vm809_vm3, %v790_v7, %v748_v8  ;;  %v793_v13 = vsel %vm334_vm1, %v2953_v31, %v702_v11 }
 0x1a0   : > { %2395 = vmatmul.mubr.msk.bf16.gmra.mrb[32].mxu1 %vm849_vm4, %v829_v12  ;;  %2429 = vmatmul.mubr.msk.bf16.gmra.mrb[32].mxu0 %vm849_vm4, %v829_v12 }
 0x1a2   : > { %v704_v14 = vpop.permute.xlu1 %703  ;;  %v750_v15 = vpop.permute.xlu0 %749 }
 0x1a3   : > { %v831_v16 = vsel %vm809_vm3, %v793_v13, %v750_v15  ;;  %v796_v18 = vsel %vm334_vm1, %v2959_v33, %v704_v14 }
 0x1a4   : > { %2398 = vmatprep.mubr.msk.bf16.mxu1 %vm849_vm4, %v831_v16  ;;  %2432 = vmatprep.mubr.msk.bf16.mxu0 %vm849_vm4, %v831_v16 }
 0x1a6   : > { %v752_v19 = vpop.permute.xlu1 %751  ;;  %v706_v20 = vpop.permute.xlu0 %705 }
 0x1a7   : > { %v833_v22 = vsel %vm809_vm3, %v796_v18, %v752_v19  ;;  %v799_v26 = vsel %vm334_vm1, %v2965_v34, %v706_v20 }
 0x1a8   : > { %2399 = vmatmul.mubr.msk.bf16.gmra.mrb[36].mxu1 %vm849_vm4, %v833_v22  ;;  %2433 = vmatmul.mubr.msk.bf16.gmra.mrb[36].mxu0 %vm849_vm4, %v833_v22 }
 0x1aa   : > { %v708_v27 = vpop.permute.xlu1 %707  ;;  %v754_v28 = vpop.permute.xlu0 %753 }
 0x1ab   : > { %v835_v53 = vsel %vm809_vm3, %v799_v26, %v754_v28  ;;  %v802_v29 = vsel %vm334_vm1, %v2971_v38, %v708_v27 }
 0x1ac   : > { %2402 = vmatprep.mubr.msk.bf16.mxu1 %vm849_vm4, %v835_v53  ;;  %2436 = vmatprep.mubr.msk.bf16.mxu0 %vm849_vm4, %v835_v53 }
 0x1ae   : > { %v756_v30 = vpop.permute.xlu1 %755  ;;  %v710_v31 = vpop.permute.xlu0 %709 }
 0x1af   : > { %v837_v33 = vsel %vm809_vm3, %v802_v29, %v756_v30  ;;  %v805_v34 = vsel %vm334_vm1, %v2977_v39, %v710_v31  ;;  %v1807_v39 = vld [vmem:[%s3788_s3] sm:$0xf] }
 0x1b0   : > { %2403 = vmatmul.mubr.msk.bf16.gmra.mrb[40].mxu1 %vm849_vm4, %v837_v33  ;;  %2437 = vmatmul.mubr.msk.bf16.gmra.mrb[40].mxu0 %vm849_vm4, %v837_v33 }
 0x1b1   : > { %2519 = vmatprep.subr.msk.bf16.mxu0 %vm1847_vm5, %v1807_v39 }
 0x1b2   : > { %v712_v41 = vpop.permute.xlu1 %711  ;;  %v758_v43 = vpop.permute.xlu0 %757 }
 0x1b3   : > { %v839_v5 = vsel %vm809_vm3, %v805_v34, %v758_v43  ;;  %v808_v38 = vsel %vm334_vm1, %v2983_v40, %v712_v41  ;;  %v1849_v40 = vsel %vm1847_vm5, %v1807_v39, 0 }
 0x1b4   : > { %2406 = vmatprep.mubr.msk.bf16.mxu1 %vm849_vm4, %v839_v5  ;;  %2440 = vmatprep.mubr.msk.bf16.mxu0 %vm849_vm4, %v839_v5 }
 0x1b5   : > { %2479 = vmatpush3.bf16.msra.mxu0 %v1849_v40 }
 0x1b6   : > { %v760_v9 = vpop.permute.xlu1 %759 }
 0x1b7   : > { %v841_v10 = vsel %vm809_vm3, %v808_v38, %v760_v9 }
 0x1b8   : > { %2407 = vmatmul.mubr.msk.bf16.gmra.mrb[44].mxu1 %vm849_vm4, %v841_v10  ;;  %2441 = vmatmul.mubr.msk.bf16.gmra.mrb[44].mxu0 %vm849_vm4, %v841_v10 }
 0x1b9   : > { %2446 = vmatprep.mubr.msk.bf16.mxu1 %vm849_vm4, %v3026_v21  ;;  %v3153_v21 = vshrl.u32 %v1222_v17, 7 }
 0x1bb   : > { %vm1259_vm6 = vcmp.lt.s32.totalorder %v3153_v21, 1  ;;  %vm1527_vm7 = vcmp.lt.s32.totalorder %v3153_v21, 7  ;;  %vm1225_vm8 = vcmp.ge.s32.totalorder %v3153_v21, 1 }
 0x1c0   : > { %2447 = vmatmul.mubr.msk.bf16.vlgmr.msra.gmra.mrb[48].mxu1 %vm849_vm4, %v3035_v35 }
 0x1c1   : > { %2450 = vmatprep.mubr.msk.bf16.mxu1 %vm849_vm4, %v3045_v45 }
 0x1c8   : > { %2451 = vmatmul.mubr.msk.bf16.gmra.mrb[52].mxu1 %vm849_vm4, %v3054_v56 }
 0x1c9   : > { %2454 = vmatprep.mubr.msk.bf16.mxu1 %vm849_vm4, %v3063_v50 }
 0x1d0   : > { %2455 = vmatmul.mubr.msk.bf16.gmra.mrb[56].mxu1 %vm849_vm4, %v3072_v54 }
 0x1d1   : > { %2458 = vmatprep.mubr.msk.bf16.mxu1 %vm849_vm4, %v823_v60 }
 0x1d8   : > { %2459 = vmatmul.mubr.msk.bf16.gmra.mrb[60].mxu1 %vm849_vm4, %v825_v0 }
 0x1d9   : > { %2462 = vmatprep.mubr.msk.bf16.mxu1 %vm849_vm4, %v827_v6 }
 0x1e0   : > { %2463 = vmatmul.mubr.msk.bf16.gmra.mrb[64].mxu1 %vm849_vm4, %v829_v12 }
 0x1e1   : > { %2466 = vmatprep.mubr.msk.bf16.mxu1 %vm849_vm4, %v831_v16 }
 0x1e8   : > { %2467 = vmatmul.mubr.msk.bf16.gmra.mrb[68].mxu1 %vm849_vm4, %v833_v22 }
 0x1e9   : > { %2470 = vmatprep.mubr.msk.bf16.mxu1 %vm849_vm4, %v835_v53 }
 0x1f0   : > { %2471 = vmatmul.mubr.msk.bf16.gmra.mrb[72].mxu1 %vm849_vm4, %v837_v33 }
 0x1f1   : > { %2474 = vmatprep.mubr.msk.bf16.mxu1 %vm849_vm4, %v839_v5 }
 0x1f8   : > { %2475 = vmatmul.mubr.msk.bf16.gmra.mrb[76].mxu1 %vm849_vm4, %v841_v10 }
 0x253   : > { %v2380_v23 = vpop.f32.mrb[16].mxu1  ;;  %v2414_v24 = vpop.f32.mrb[16].mxu0 }
 0x254   : > { %v3155_v25 = vpop.f32.mrb[17].mxu1  ;;  %v3157_v32 = vpop.f32.mrb[17].mxu0  ;;  %v1229_v37 = vrot.slane %v2380_v23, 7  ;;  %v1497_v44 = vrot.slane %v2414_v24, 1 }
 0x255   : > { %v2381_v35 = vpop.f32.mrb[18].mxu1  ;;  %v2415_v36 = vpop.f32.mrb[18].mxu0  ;;  %v3794_v56 = vrot.slane %v3155_v25, 7  ;;  %v3793_v59 = vrot.slane %v3157_v32, 1 }
 0x256   : > { %v1230_v45 = vrot.slane %v2381_v35, 7  ;;  %v1498_v46 = vrot.slane %v2415_v36, 1  ;;  %v923_v49 = vpop.f32.mrb[19].mxu1  ;;  %v1098_v1 = vpop.f32.mrb[19].mxu0 }
 0x257   : > { %v1228_v47 = vrot.slane %v923_v49, 7  ;;  %v1496_v48 = vrot.slane %v1098_v1, 1 }
 0x258   : > { %v3165_v50 = vsel %vm1527_vm7, %v1497_v44, %v1498_v46  ;;  %v3169_v42 = vsel %vm1259_vm6, %v1229_v37, %v1230_v45 }
 0x259   : > { %v3173_v51 = vsel %vm1259_vm6, %v1228_v47, %v1229_v37  ;;  %v3179_v52 = vsel %vm1527_vm7, %v3793_v59, %v1496_v48  ;;  %v3185_v54 = vsel %vm1259_vm6, %v3794_v56, %v1228_v47  ;;  %v3189_v55 = vsel %vm1527_vm7, %v1496_v48, %v1497_v44 }
 0x25b   : > { %v2384_v57 = vpop.f32.mrb[20].mxu1  ;;  %v2418_v58 = vpop.f32.mrb[20].mxu0 }
 0x25c   : > { %v936_v60 = vpop.f32.mrb[21].mxu1  ;;  %v1111_v61 = vpop.f32.mrb[21].mxu0  ;;  %v1233_v3 = vrot.slane %v2384_v57, 7  ;;  %v1501_v4 = vrot.slane %v2418_v58, 1 }
 0x25d   : > { %v1231_v62 = vrot.slane %v936_v60, 7  ;;  %v1499_v63 = vrot.slane %v1111_v61, 1  ;;  %v2385_v0 = vpop.f32.mrb[22].mxu1  ;;  %v2419_v2 = vpop.f32.mrb[22].mxu0 }
 0x25e   : > { %v1234_v6 = vrot.slane %v2385_v0, 7  ;;  %v1502_v7 = vrot.slane %v2419_v2, 1  ;;  %v939_v8 = vpop.f32.mrb[23].mxu1  ;;  %v1114_v11 = vpop.f32.mrb[23].mxu0 }
 0x25f   : > { %v1232_v12 = vrot.slane %v939_v8, 7  ;;  %v1500_v13 = vrot.slane %v1114_v11, 1  ;;  %v3193_v14 = vsel %vm1527_vm7, %v1498_v46, %v1499_v63  ;;  %v3197_v15 = vsel %vm1259_vm6, %v1230_v45, %v1231_v62 }
 0x260   : > { %v3201_v16 = vsel %vm1527_vm7, %v1501_v4, %v1502_v7  ;;  %v3205_v18 = vsel %vm1259_vm6, %v1233_v3, %v1234_v6 }
 0x261   : > { %v3209_v19 = vsel %vm1259_vm6, %v1232_v12, %v1233_v3  ;;  %v3213_v20 = vsel %vm1527_vm7, %v1499_v63, %v1500_v13  ;;  %v3217_v22 = vsel %vm1259_vm6, %v1231_v62, %v1232_v12  ;;  %v3221_v26 = vsel %vm1527_vm7, %v1500_v13, %v1501_v4 }
 0x263   : > { %v2388_v27 = vpop.f32.mrb[24].mxu1  ;;  %v2422_v28 = vpop.f32.mrb[24].mxu0 }
 0x264   : > { %v952_v53 = vpop.f32.mrb[25].mxu1  ;;  %v1127_v29 = vpop.f32.mrb[25].mxu0  ;;  %v1237_v41 = vrot.slane %v2388_v27, 7  ;;  %v1505_v43 = vrot.slane %v2422_v28, 1 }
 0x265   : > { %v1235_v30 = vrot.slane %v952_v53, 7  ;;  %v1503_v31 = vrot.slane %v1127_v29, 1  ;;  %v2389_v33 = vpop.f32.mrb[26].mxu1  ;;  %v2423_v34 = vpop.f32.mrb[26].mxu0 }
 0x266   : > { %v1238_v5 = vrot.slane %v2389_v33, 7  ;;  %v1506_v38 = vrot.slane %v2423_v34, 1  ;;  %v955_v9 = vpop.f32.mrb[27].mxu1  ;;  %v1130_v10 = vpop.f32.mrb[27].mxu0 }
 0x267   : > { %v1236_v39 = vrot.slane %v955_v9, 7  ;;  %v1504_v40 = vrot.slane %v1130_v10, 1  ;;  %v3225_v17 = vsel %vm1527_vm7, %v1502_v7, %v1503_v31  ;;  %v3229_v23 = vsel %vm1259_vm6, %v1234_v6, %v1235_v30 }
 0x268   : > { %v3233_v24 = vsel %vm1527_vm7, %v1505_v43, %v1506_v38  ;;  %v3237_v35 = vsel %vm1259_vm6, %v1237_v41, %v1238_v5 }
 0x269   : > { %v3241_v36 = vsel %vm1259_vm6, %v1236_v39, %v1237_v41  ;;  %v3245_v37 = vsel %vm1527_vm7, %v1503_v31, %v1504_v40  ;;  %v3249_v44 = vsel %vm1259_vm6, %v1235_v30, %v1236_v39  ;;  %v3253_v45 = vsel %vm1527_vm7, %v1504_v40, %v1505_v43 }
 0x26b   : > { %v2392_v46 = vpop.f32.mrb[28].mxu1  ;;  %v2426_v49 = vpop.f32.mrb[28].mxu0 }
 0x26c   : > { %v968_v1 = vpop.f32.mrb[29].mxu1  ;;  %v1143_v47 = vpop.f32.mrb[29].mxu0  ;;  %v1241_v61 = vrot.slane %v2392_v46, 7  ;;  %v1509_v62 = vrot.slane %v2426_v49, 1 }
 0x26d   : > { %v1239_v48 = vrot.slane %v968_v1, 7  ;;  %v1507_v57 = vrot.slane %v1143_v47, 1  ;;  %v2393_v58 = vpop.f32.mrb[30].mxu1  ;;  %v2427_v60 = vpop.f32.mrb[30].mxu0 }
 0x26e   : > { %v1242_v63 = vrot.slane %v2393_v58, 7  ;;  %v1510_v0 = vrot.slane %v2427_v60, 1  ;;  %v971_v2 = vpop.f32.mrb[31].mxu1  ;;  %v1146_v3 = vpop.f32.mrb[31].mxu0 }
 0x26f   : > { %v1240_v4 = vrot.slane %v971_v2, 7  ;;  %v1508_v6 = vrot.slane %v1146_v3, 1  ;;  %v3257_v7 = vsel %vm1527_vm7, %v1506_v38, %v1507_v57  ;;  %v3261_v8 = vsel %vm1259_vm6, %v1238_v5, %v1239_v48 }
 0x270   : > { %v3265_v11 = vsel %vm1527_vm7, %v1509_v62, %v1510_v0  ;;  %v3269_v12 = vsel %vm1259_vm6, %v1241_v61, %v1242_v63 }
 0x271   : > { %v3273_v13 = vsel %vm1259_vm6, %v1240_v4, %v1241_v61  ;;  %v3277_v27 = vsel %vm1527_vm7, %v1507_v57, %v1508_v6  ;;  %v3281_v28 = vsel %vm1259_vm6, %v1239_v48, %v1240_v4  ;;  %v3285_v53 = vsel %vm1527_vm7, %v1508_v6, %v1509_v62 }
 0x273   : > { %v2396_v29 = vpop.f32.mrb[32].mxu1  ;;  %v2430_v30 = vpop.f32.mrb[32].mxu0 }
 0x274   : > { %v984_v31 = vpop.f32.mrb[33].mxu1  ;;  %v1159_v33 = vpop.f32.mrb[33].mxu0  ;;  %v1245_v38 = vrot.slane %v2396_v29, 7  ;;  %v1513_v9 = vrot.slane %v2430_v30, 1 }
 0x275   : > { %v1243_v34 = vrot.slane %v984_v31, 7  ;;  %v1511_v41 = vrot.slane %v1159_v33, 1  ;;  %v2397_v43 = vpop.f32.mrb[34].mxu1  ;;  %v2431_v5 = vpop.f32.mrb[34].mxu0 }
 0x276   : > { %v1246_v10 = vrot.slane %v2397_v43, 7  ;;  %v1514_v39 = vrot.slane %v2431_v5, 1  ;;  %v987_v40 = vpop.f32.mrb[35].mxu1  ;;  %v1162_v46 = vpop.f32.mrb[35].mxu0 }
 0x277   : > { %v1244_v49 = vrot.slane %v987_v40, 7  ;;  %v1512_v1 = vrot.slane %v1162_v46, 1  ;;  %v3289_v47 = vsel %vm1527_vm7, %v1510_v0, %v1511_v41  ;;  %v3293_v48 = vsel %vm1259_vm6, %v1242_v63, %v1243_v34 }
 0x278   : > { %v3297_v57 = vsel %vm1527_vm7, %v1513_v9, %v1514_v39  ;;  %v3301_v58 = vsel %vm1259_vm6, %v1245_v38, %v1246_v10 }
 0x279   : > { %v3305_v60 = vsel %vm1259_vm6, %v1244_v49, %v1245_v38  ;;  %v3309_v61 = vsel %vm1527_vm7, %v1511_v41, %v1512_v1  ;;  %v3313_v62 = vsel %vm1259_vm6, %v1243_v34, %v1244_v49  ;;  %v3317_v63 = vsel %vm1527_vm7, %v1512_v1, %v1513_v9 }
 0x27b   : > { %v2400_v0 = vpop.f32.mrb[36].mxu1  ;;  %v2434_v2 = vpop.f32.mrb[36].mxu0 }
 0x27c   : > { %v1000_v3 = vpop.f32.mrb[37].mxu1  ;;  %v1175_v4 = vpop.f32.mrb[37].mxu0  ;;  %v1249_v33 = vrot.slane %v2400_v0, 7  ;;  %v1517_v43 = vrot.slane %v2434_v2, 1 }
 0x27d   : > { %v1247_v6 = vrot.slane %v1000_v3, 7  ;;  %v1515_v29 = vrot.slane %v1175_v4, 1  ;;  %v2401_v30 = vpop.f32.mrb[38].mxu1  ;;  %v2435_v31 = vpop.f32.mrb[38].mxu0 }
 0x27e   : > { %v1250_v41 = vrot.slane %v2401_v30, 7  ;;  %v1518_v5 = vrot.slane %v2435_v31, 1  ;;  %v1003_v38 = vpop.f32.mrb[39].mxu1  ;;  %v1178_v40 = vpop.f32.mrb[39].mxu0 }
 0x27f   : > { %v1248_v34 = vrot.slane %v1003_v38, 7  ;;  %v1516_v46 = vrot.slane %v1178_v40, 1  ;;  %v3321_v9 = vsel %vm1527_vm7, %v1514_v39, %v1515_v29  ;;  %v3325_v49 = vsel %vm1259_vm6, %v1246_v10, %v1247_v6 }
 0x280   : > { %3797 = vst [vmem:[#allocation6_spill] sm:$0xff] %v3325_v49  ;;  %v3329_v1 = vsel %vm1527_vm7, %v1517_v43, %v1518_v5  ;;  %v3333_v0 = vsel %vm1259_vm6, %v1249_v33, %v1250_v41 }
 0x281   : > { %3798 = vst [vmem:[#allocation7_spill] sm:$0xff] %v3329_v1  ;;  %3799 = vst [vmem:[#allocation8_spill] sm:$0xff] %v3333_v0  ;;  %v3337_v2 = vsel %vm1259_vm6, %v1248_v34, %v1249_v33  ;;  %v3341_v39 = vsel %vm1527_vm7, %v1515_v29, %v1516_v46  ;;  %v3345_v10 = vsel %vm1259_vm6, %v1247_v6, %v1248_v34 }
 0x282   : > { %3800 = vst [vmem:[#allocation9_spill] sm:$0xff] %v3337_v2  ;;  %3801 = vst [vmem:[#allocation10_spill] sm:$0xff] %v3341_v39  ;;  %v3349_v3 = vsel %vm1527_vm7, %v1516_v46, %v1517_v43 }
 0x283   : > { %3802 = vst [vmem:[#allocation11_spill] sm:$0xff] %v3345_v10  ;;  %3803 = vst [vmem:[#allocation12_spill] sm:$0xff] %v3349_v3  ;;  %v2404_v4 = vpop.f32.mrb[40].mxu1  ;;  %v2438_v30 = vpop.f32.mrb[40].mxu0 }
 0x284   : > { %v1016_v31 = vpop.f32.mrb[41].mxu1  ;;  %v1191_v38 = vpop.f32.mrb[41].mxu0  ;;  %v1253_v0 = vrot.slane %v2404_v4, 7  ;;  %v1521_v1 = vrot.slane %v2438_v30, 1 }
 0x285   : > { %v1251_v40 = vrot.slane %v1016_v31, 7  ;;  %v1519_v59 = vrot.slane %v1191_v38, 1  ;;  %v2405_v33 = vpop.f32.mrb[42].mxu1  ;;  %v2439_v56 = vpop.f32.mrb[42].mxu0 }
 0x286   : > { %v1254_v29 = vrot.slane %v2405_v33, 7  ;;  %v1522_v39 = vrot.slane %v2439_v56, 1  ;;  %v1019_v49 = vpop.f32.mrb[43].mxu1  ;;  %v1194_v2 = vpop.f32.mrb[43].mxu0 }
 0x287   : > { %v1252_v6 = vrot.slane %v1019_v49, 7  ;;  %v1520_v34 = vrot.slane %v1194_v2, 1  ;;  %v3353_v43 = vsel %vm1527_vm7, %v1518_v5, %v1519_v59  ;;  %v3357_v46 = vsel %vm1259_vm6, %v1250_v41, %v1251_v40 }
 0x288   : > { %3804 = vst [vmem:[#allocation13_spill] sm:$0xff] %v3353_v43  ;;  %3805 = vst [vmem:[#allocation14_spill] sm:$0xff] %v3357_v46  ;;  %v3361_v31 = vsel %vm1527_vm7, %v1521_v1, %v1522_v39  ;;  %v3365_v4 = vsel %vm1259_vm6, %v1253_v0, %v1254_v29 }
 0x289   : > { %3806 = vst [vmem:[#allocation15_spill] sm:$0xff] %v3361_v31  ;;  %3807 = vst [vmem:[#allocation16_spill] sm:$0xff] %v3365_v4  ;;  %v3369_v56 = vsel %vm1259_vm6, %v1252_v6, %v1253_v0  ;;  %v3373_v5 = vsel %vm1527_vm7, %v1519_v59, %v1520_v34  ;;  %v3377_v41 = vsel %vm1259_vm6, %v1251_v40, %v1252_v6 }
 0x28a   : > { %3808 = vst [vmem:[#allocation17_spill] sm:$0xff] %v3369_v56  ;;  %3809 = vst [vmem:[#allocation18_spill] sm:$0xff] %v3373_v5  ;;  %v3381_v49 = vsel %vm1527_vm7, %v1520_v34, %v1521_v1 }
 0x28b   : > { %v2408_v2 = vpop.f32.mrb[44].mxu1  ;;  %v2442_v30 = vpop.f32.mrb[44].mxu0 }
 0x28c   : > { %v1032_v38 = vpop.f32.mrb[45].mxu1  ;;  %v1207_v33 = vpop.f32.mrb[45].mxu0  ;;  %v1257_v56 = vrot.slane %v2408_v2, 7  ;;  %v1525_v3 = vrot.slane %v2442_v30, 1 }
 0x28d   : > { %v1255_v4 = vrot.slane %v1032_v38, 7  ;;  %v1523_v31 = vrot.slane %v1207_v33, 1  ;;  %v2409_v0 = vpop.f32.mrb[46].mxu1  ;;  %v2443_v46 = vpop.f32.mrb[46].mxu0  ;;  %v3810_v38 = vrot.slane %v3155_v25, 7 }
 0x28e   : > { %v1258_v59 = vrot.slane %v2409_v0, 7  ;;  %v1526_v5 = vrot.slane %v2443_v46, 1  ;;  %v1035_v10 = vpop.f32.mrb[47].mxu1  ;;  %v1210_v43 = vpop.f32.mrb[47].mxu0 }
 0x28f   : > { %v1256_v40 = vrot.slane %v1035_v10, 7  ;;  %v1524_v6 = vrot.slane %v1210_v43, 1  ;;  %v3385_v1 = vsel %vm1527_vm7, %v1522_v39, %v1523_v31  ;;  %v3389_v34 = vsel %vm1259_vm6, %v1254_v29, %v1255_v4 }
 0x290   : > { %v1291_v2 = vsel %vm1259_vm6, %v1258_v59, %v3810_v38  ;;  %v3398_v46 = vsel %vm1527_vm7, %v1525_v3, %v1526_v5  ;;  %v3401_v10 = vadd.s32 8, %v3153_v21  ;;  %v3413_v25 = vsel %vm1259_vm6, %v1257_v56, %v1258_v59 }
 0x291   : > { %v3405_v39 = vsel %vm1259_vm6, %v1256_v40, %v1257_v56  ;;  %v3409_v29 = vsel %vm1527_vm7, %v1523_v31, %v1524_v6  ;;  %v3811_v43 = vrot.slane %v3157_v32, 1  ;;  %v3423_v33 = vsel %vm1259_vm6, %v1255_v4, %v1256_v40 }
 0x292   : > { %v3427_v0 = vsel %vm1527_vm7, %v1524_v6, %v1525_v3  ;;  %v1294_v31 = vsel %vm1225_vm8, %v3173_v51, 0.0  ;;  %v1292_v32 = vsel %vm1225_vm8, %v1291_v2, 0.0  ;;  %vm1494_vm9 = vcmp.le.s32.totalorder %v3401_v10, 14 }
 0x293   : > { %v3419_v30 = vsel %vm1527_vm7, %v1526_v5, %v3811_v43  ;;  %3812 = vst [vmem:[#allocation19_spill] sm:$0xff] %v3427_v0  ;;  %v2448_v56 = vpop.f32.mrb[48].mxu1  ;;  %v3437_v5 = vld [vmem:[%s3790_s5] ss:$0 sm:$0xff]  ;;  %v1563_v2 = vsel %vm1494_vm9, %v3193_v14, 0.0  ;;  %v1298_v14 = vsel %vm1225_vm8, %v3209_v19, 0.0  ;;  %v1728_v19 = vpop.permute.xlu0 %1727 }
 0x294   : > { %v1375_v59 = vadd.f32 %v2448_v56, %v1294_v31  ;;  %v1366_v38 = vpop.f32.mrb[49].mxu1 }
 0x295   : > { %v1367_v4 = vadd.f32 %v1366_v38, %v1292_v32  ;;  %v2449_v40 = vpop.f32.mrb[50].mxu1  ;;  %v1561_v32 = vsel %vm1494_vm9, %v3189_v55, 0.0 }
 0x296   : > { %v1594_v3 = vadd.f32 %v3165_v50, %v1375_v59  ;;  %v1378_v6 = vadd.f32 %v2449_v40, %v3169_v42  ;;  %v1369_v51 = vpop.f32.mrb[51].mxu1 }
 0x297   : > { %v1592_v43 = vadd.f32 %v3179_v52, %v1367_v4  ;;  %v1370_v31 = vadd.f32 %v1369_v51, %v3185_v54 }
 0x298   : > { %v1633_v56 = vadd.f32 %v3437_v5, %v1594_v3  ;;  %v1595_v0 = vadd.f32 %v1563_v2, %v1378_v6  ;;  %v1296_v3 = vsel %vm1225_vm8, %v3197_v15, 0.0 }
 0x299   : > { %v1631_v50 = vadd.f32 %v3437_v5, %v1592_v43  ;;  %v1593_v59 = vadd.f32 %v1561_v32, %v1370_v31 }
 0x29a   : > { %v1634_v42 = vadd.f32 %v3437_v5, %v1595_v0  ;;  %v1665_v54 = vmax.f32 %v1633_v56, 0.0 }
 0x29b   : > { %v1632_v52 = vadd.f32 %v3437_v5, %v1593_v59  ;;  %v2452_v38 = vpop.f32.mrb[52].mxu1  ;;  %v1663_v6 = vmax.f32 %v1631_v50, 0.0 }
 0x29c   : > { %v1666_v4 = vmax.f32 %v1634_v42, 0.0  ;;  %v1391_v40 = vadd.f32 %v2452_v38, %v1298_v14  ;;  %v1382_v55 = vpop.f32.mrb[53].mxu1  ;;  %v1567_v42 = vsel %vm1494_vm9, %v3225_v17, 0.0  ;;  %v1730_v14 = vpop.permute.xlu1 %1729 }
 0x29d   : > { %v1664_v51 = vmax.f32 %v1632_v52, 0.0  ;;  %v1383_v43 = vadd.f32 %v1382_v55, %v1296_v3  ;;  %v2453_v2 = vpop.f32.mrb[54].mxu1 }
 0x29e   : > { %v1598_v0 = vadd.f32 %v3201_v16, %v1391_v40  ;;  %v1394_v31 = vadd.f32 %v2453_v2, %v3205_v18  ;;  %v1385_v32 = vpop.f32.mrb[55].mxu1  ;;  %v1696_v59 = vpack.c.bf16 %v1666_v4, %v1665_v54  ;;  %v1565_v16 = vsel %vm1494_vm9, %v3221_v26, 0.0 }
 0x29f   : > { %v1596_v56 = vadd.f32 %v3213_v20, %v1383_v43  ;;  %v1386_v15 = vadd.f32 %v1385_v32, %v3217_v22  ;;  %v1695_v50 = vpack.c.bf16 %v1664_v51, %v1663_v6  ;;  %v1302_v40 = vsel %vm1225_vm8, %v3241_v36, 0.0 }
 0x2a0   : > { %v1637_v52 = vadd.f32 %v3437_v5, %v1598_v0  ;;  %v1599_v38 = vadd.f32 %v1567_v42, %v1394_v31  ;;  %v1764_v17 = vsel %vm334_vm1, %v1696_v59, %v1730_v14  ;;  %v1300_v51 = vsel %vm1225_vm8, %v3229_v23, 0.0  ;;  %v1732_v42 = vpop.permute.xlu0 %1731 }
 0x2a1   : > { %v1635_v18 = vadd.f32 %v3437_v5, %v1596_v56  ;;  %v1597_v54 = vadd.f32 %v1565_v16, %v1386_v15  ;;  %v1761_v20 = vsel %vm334_vm1, %v1695_v50, %v1728_v19  ;;  %v1571_v14 = vsel %vm1494_vm9, %v3257_v7, 0.0  ;;  %v1734_v50 = vpop.permute.xlu1 %1733 }
 0x2a2   : > { %v1638_v4 = vadd.f32 %v3437_v5, %v1599_v38  ;;  %2480 = vmatprep.mubr.msk.bf16.mxu0 %vm809_vm3, %v1761_v20  ;;  %v1669_v26 = vmax.f32 %v1637_v52, 0.0  ;;  %v1306_v20 = vsel %vm1225_vm8, %v3273_v13, 0.0 }
 0x2a3   : > { %v1636_v22 = vadd.f32 %v3437_v5, %v1597_v54  ;;  %v2456_v3 = vpop.f32.mrb[56].mxu1  ;;  %2481 = vmatmul.mubr.msk.bf16.vlgmr.msra.gmra.mrb[48].mxu0 %vm809_vm3, %v1764_v17  ;;  %v1667_v2 = vmax.f32 %v1635_v18, 0.0 }
 0x2a4   : > { %v1670_v55 = vmax.f32 %v1638_v4, 0.0  ;;  %v1407_v6 = vadd.f32 %v2456_v3, %v1302_v40  ;;  %v1398_v43 = vpop.f32.mrb[57].mxu1  ;;  %v1304_v40 = vsel %vm1225_vm8, %v3261_v8, 0.0 }
 0x2a5   : > { %v1668_v0 = vmax.f32 %v1636_v22, 0.0  ;;  %v1399_v31 = vadd.f32 %v1398_v43, %v1300_v51  ;;  %v2457_v32 = vpop.f32.mrb[58].mxu1 }
 0x2a6   : > { %v1602_v59 = vadd.f32 %v3233_v24, %v1407_v6  ;;  %v1410_v19 = vadd.f32 %v2457_v32, %v3237_v35  ;;  %v1401_v36 = vpop.f32.mrb[59].mxu1  ;;  %v1698_v56 = vpack.c.bf16 %v1670_v55, %v1669_v26  ;;  %v1569_v24 = vsel %vm1494_vm9, %v3253_v45, 0.0 }
 0x2a7   : > { %v1600_v15 = vadd.f32 %v3245_v37, %v1399_v31  ;;  %v1402_v23 = vadd.f32 %v1401_v36, %v3249_v44  ;;  %v1697_v52 = vpack.c.bf16 %v1668_v0, %v1667_v2  ;;  %v1736_v31 = vpop.permute.xlu0 %1735 }
 0x2a8   : > { %v1641_v38 = vadd.f32 %v3437_v5, %v1602_v59  ;;  %v1603_v16 = vadd.f32 %v1571_v14, %v1410_v19  ;;  %v1770_v7 = vsel %vm334_vm1, %v1698_v56, %v1734_v50  ;;  %v1575_v59 = vsel %vm1494_vm9, %v3289_v47, 0.0  ;;  %v1738_v19 = vpop.permute.xlu1 %1737 }
 0x2a9   : > { %v1639_v35 = vadd.f32 %v3437_v5, %v1600_v15  ;;  %v1601_v18 = vadd.f32 %v1569_v24, %v1402_v23  ;;  %v1767_v37 = vsel %vm334_vm1, %v1697_v52, %v1732_v42  ;;  %v1310_v23 = vsel %vm1225_vm8, %v3305_v60, 0.0 }
 0x2aa   : > { %v1642_v54 = vadd.f32 %v3437_v5, %v1603_v16  ;;  %2484 = vmatprep.mubr.msk.bf16.mxu0 %vm809_vm3, %v1767_v37  ;;  %v1673_v45 = vmax.f32 %v1641_v38, 0.0  ;;  %v1308_v16 = vsel %vm1225_vm8, %v3293_v48, 0.0 }
 0x2ab   : > { %v1640_v44 = vadd.f32 %v3437_v5, %v1601_v18  ;;  %v2460_v4 = vpop.f32.mrb[60].mxu1  ;;  %2485 = vmatmul.mubr.msk.bf16.gmra.mrb[52].mxu0 %vm809_vm3, %v1770_v7  ;;  %v1671_v26 = vmax.f32 %v1639_v35, 0.0 }
 0x2ac   : > { %v1674_v17 = vmax.f32 %v1642_v54, 0.0  ;;  %v1423_v22 = vadd.f32 %v2460_v4, %v1306_v20  ;;  %v1414_v3 = vpop.f32.mrb[61].mxu1  ;;  %v1740_v4 = vpop.permute.xlu0 %1739 }
 0x2ad   : > { %v1672_v55 = vmax.f32 %v1640_v44, 0.0  ;;  %v1415_v6 = vadd.f32 %v1414_v3, %v1304_v40  ;;  %v2461_v51 = vpop.f32.mrb[62].mxu1 }
 0x2ae   : > { %v1606_v43 = vadd.f32 %v3265_v11, %v1423_v22  ;;  %v1426_v2 = vadd.f32 %v2461_v51, %v3269_v12  ;;  %v1417_v13 = vpop.f32.mrb[63].mxu1  ;;  %v1700_v0 = vpack.c.bf16 %v1674_v17, %v1673_v45  ;;  %v1573_v11 = vsel %vm1494_vm9, %v3285_v53, 0.0  ;;  %v1742_v22 = vpop.permute.xlu1 %1741  ;;  %v3813_v51 = vld [vmem:[#allocation9_spill] sm:$0xff] }
 0x2af   : > { %v1604_v32 = vadd.f32 %v3277_v27, %v1415_v6  ;;  %v1418_v8 = vadd.f32 %v1417_v13, %v3281_v28  ;;  %v1699_v36 = vpack.c.bf16 %v1672_v55, %v1671_v26  ;;  %v1579_v17 = vsel %vm1494_vm9, %v3321_v9, 0.0 }
 0x2b0   : > { %v1645_v56 = vadd.f32 %v3437_v5, %v1606_v43  ;;  %v1607_v42 = vadd.f32 %v1575_v59, %v1426_v2  ;;  %v1776_v47 = vsel %vm334_vm1, %v1700_v0, %v1738_v19  ;;  %v1314_v43 = vsel %vm1225_vm8, %v3813_v51, 0.0  ;;  %v3823_v51 = vld [vmem:[#allocation15_spill] sm:$0xff] }
 0x2b1   : > { %v1643_v12 = vadd.f32 %v3437_v5, %v1604_v32  ;;  %v1605_v15 = vadd.f32 %v1573_v11, %v1418_v8  ;;  %v1773_v27 = vsel %vm334_vm1, %v1699_v36, %v1736_v31  ;;  %v3814_v31 = vld [vmem:[#allocation6_spill] sm:$0xff] }
 0x2b2   : > { %v1646_v14 = vadd.f32 %v3437_v5, %v1607_v42  ;;  %2488 = vmatprep.mubr.msk.bf16.mxu0 %vm809_vm3, %v1773_v27  ;;  %v1677_v53 = vmax.f32 %v1645_v56, 0.0  ;;  %v1312_v32 = vsel %vm1225_vm8, %v3814_v31, 0.0  ;;  %v3815_v42 = vld [vmem:[#allocation7_spill] sm:$0xff] }
 0x2b3   : > { %v1644_v28 = vadd.f32 %v3437_v5, %v1605_v15  ;;  %v2464_v50 = vpop.f32.mrb[64].mxu1  ;;  %2489 = vmatmul.mubr.msk.bf16.gmra.mrb[56].mxu0 %vm809_vm3, %v1776_v47  ;;  %v1675_v35 = vmax.f32 %v1643_v12, 0.0  ;;  %v3816_v12 = vld [vmem:[#allocation8_spill] sm:$0xff]  ;;  %v1744_v47 = vpop.permute.xlu0 %1743 }
 0x2b4   : > { %v1678_v52 = vmax.f32 %v1646_v14, 0.0  ;;  %v1439_v38 = vadd.f32 %v2464_v50, %v1310_v23  ;;  %v1430_v24 = vpop.f32.mrb[65].mxu1  ;;  %v3818_v50 = vld [vmem:[#allocation13_spill] sm:$0xff] }
 0x2b5   : > { %v1676_v18 = vmax.f32 %v1644_v28, 0.0  ;;  %v1431_v37 = vadd.f32 %v1430_v24, %v1308_v16  ;;  %v2465_v54 = vpop.f32.mrb[66].mxu1  ;;  %v3817_v28 = vld [vmem:[#allocation10_spill] sm:$0xff]  ;;  %v1746_v16 = vpop.permute.xlu1 %1745 }
 0x2b6   : > { %v1610_v7 = vadd.f32 %v3297_v57, %v1439_v38  ;;  %v1442_v44 = vadd.f32 %v2465_v54, %v3301_v58  ;;  %v1433_v60 = vpop.f32.mrb[67].mxu1  ;;  %v1702_v20 = vpack.c.bf16 %v1678_v52, %v1677_v53  ;;  %v1577_v57 = vsel %vm1494_vm9, %v3317_v63, 0.0  ;;  %v3819_v52 = vld [vmem:[#allocation11_spill] sm:$0xff] }
 0x2b7   : > { %v1608_v45 = vadd.f32 %v3309_v61, %v1431_v37  ;;  %v1434_v48 = vadd.f32 %v1433_v60, %v3313_v62  ;;  %v1701_v40 = vpack.c.bf16 %v1676_v18, %v1675_v35  ;;  %v1583_v53 = vsel %vm1494_vm9, %v3818_v50, 0.0  ;;  %v3820_v37 = vld [vmem:[#allocation12_spill] sm:$0xff]  ;;  %v1748_v31 = vpop.permute.xlu0 %1747 }
 0x2b8   : > { %v1649_v3 = vadd.f32 %v3437_v5, %v1610_v7  ;;  %v1611_v26 = vadd.f32 %v1579_v17, %v1442_v44  ;;  %v1782_v9 = vsel %vm334_vm1, %v1702_v20, %v1742_v22  ;;  %v1581_v54 = vsel %vm1494_vm9, %v3820_v37, 0.0  ;;  %v3821_v17 = vld [vmem:[#allocation17_spill] sm:$0xff] }
 0x2b9   : > { %v1647_v58 = vadd.f32 %v3437_v5, %v1608_v45  ;;  %v1609_v55 = vadd.f32 %v1577_v57, %v1434_v48  ;;  %v1779_v61 = vsel %vm334_vm1, %v1701_v40, %v1740_v4  ;;  %v1318_v48 = vsel %vm1225_vm8, %v3821_v17, 0.0  ;;  %v3822_v57 = vld [vmem:[#allocation14_spill] sm:$0xff] }
 0x2ba   : > { %v1650_v6 = vadd.f32 %v3437_v5, %v1611_v26  ;;  %2492 = vmatprep.mubr.msk.bf16.mxu0 %vm809_vm3, %v1779_v61  ;;  %v1681_v63 = vmax.f32 %v1649_v3, 0.0 }
 0x2bb   : > { %v1648_v62 = vadd.f32 %v3437_v5, %v1609_v55  ;;  %v2468_v2 = vpop.f32.mrb[68].mxu1  ;;  %2493 = vmatmul.mubr.msk.bf16.gmra.mrb[60].mxu0 %vm809_vm3, %v1782_v9  ;;  %v1679_v8 = vmax.f32 %v1647_v58, 0.0  ;;  %v1316_v58 = vsel %vm1225_vm8, %v3822_v57, 0.0 }
 0x2bc   : > { %v1682_v13 = vmax.f32 %v1650_v6, 0.0  ;;  %v1455_v0 = vadd.f32 %v2468_v2, %v1314_v43  ;;  %v1446_v59 = vpop.f32.mrb[69].mxu1  ;;  %v3824_v2 = vld [vmem:[#allocation16_spill] sm:$0xff] }
 0x2bd   : > { %v1680_v19 = vmax.f32 %v1648_v62, 0.0  ;;  %v1447_v36 = vadd.f32 %v1446_v59, %v1312_v32  ;;  %v2469_v56 = vpop.f32.mrb[70].mxu1  ;;  %v3825_v32 = vld [vmem:[#allocation18_spill] sm:$0xff] }
 0x2be   : > { %v1614_v11 = vadd.f32 %v3815_v42, %v1455_v0  ;;  %v1458_v15 = vadd.f32 %v2469_v56, %v3816_v12  ;;  %v1449_v27 = vpop.f32.mrb[71].mxu1  ;;  %v1704_v14 = vpack.c.bf16 %v1682_v13, %v1681_v63  ;;  %v1585_v12 = vsel %vm1494_vm9, %v3381_v49, 0.0 }
 0x2bf   : > { %v1612_v23 = vadd.f32 %v3817_v28, %v1447_v36  ;;  %v1450_v38 = vadd.f32 %v1449_v27, %v3819_v52  ;;  %v1703_v24 = vpack.c.bf16 %v1680_v19, %v1679_v8  ;;  %v1587_v8 = vsel %vm1494_vm9, %v3385_v1, 0.0  ;;  %v1750_v36 = vpop.permute.xlu1 %1749 }
 0x2c0   : > { %v1653_v35 = vadd.f32 %v3437_v5, %v1614_v11  ;;  %v1615_v18 = vadd.f32 %v1583_v53, %v1458_v15  ;;  %v1788_v4 = vsel %vm334_vm1, %v1704_v14, %v1746_v16  ;;  %v1322_v28 = vsel %vm1225_vm8, %v3405_v39, 0.0 }
 0x2c1   : > { %v1651_v7 = vadd.f32 %v3437_v5, %v1612_v23  ;;  %v1613_v44 = vadd.f32 %v1581_v54, %v1450_v38  ;;  %v1785_v60 = vsel %vm334_vm1, %v1703_v24, %v1744_v47  ;;  %v1320_v52 = vsel %vm1225_vm8, %v3389_v34, 0.0 }
 0x2c2   : > { %v1654_v20 = vadd.f32 %v3437_v5, %v1615_v18  ;;  %2496 = vmatprep.mubr.msk.bf16.mxu0 %vm809_vm3, %v1785_v60  ;;  %v1685_v40 = vmax.f32 %v1653_v35, 0.0 }
 0x2c3   : > { %v1652_v45 = vadd.f32 %v3437_v5, %v1613_v44  ;;  %v2472_v22 = vpop.f32.mrb[72].mxu1  ;;  %2497 = vmatmul.mubr.msk.bf16.gmra.mrb[64].mxu0 %vm809_vm3, %v1788_v4  ;;  %v1683_v61 = vmax.f32 %v1651_v7, 0.0  ;;  %v1752_v44 = vpop.permute.xlu0 %1751 }
 0x2c4   : > { %v1686_v3 = vmax.f32 %v1654_v20, 0.0  ;;  %v1471_v26 = vadd.f32 %v2472_v22, %v1318_v48  ;;  %v1462_v55 = vpop.f32.mrb[73].mxu1  ;;  %v1591_v20 = vsel %vm1494_vm9, %v3419_v30, 0.0  ;;  %v1754_v34 = vpop.permute.xlu1 %1753  ;;  %v3826_v48 = vld [vmem:[#allocation19_spill] sm:$0xff] }
 0x2c5   : > { %v1684_v6 = vmax.f32 %v1652_v45, 0.0  ;;  %v1463_v9 = vadd.f32 %v1462_v55, %v1316_v58  ;;  %v2473_v62 = vpop.f32.mrb[74].mxu1 }
 0x2c6   : > { %v1618_v43 = vadd.f32 %v3823_v51, %v1471_v26  ;;  %v1474_v63 = vadd.f32 %v2473_v62, %v3824_v2  ;;  %v1465_v13 = vpop.f32.mrb[75].mxu1  ;;  %v1706_v0 = vpack.c.bf16 %v1686_v3, %v1685_v40 }
 0x2c7   : > { %v1616_v59 = vadd.f32 %v3825_v32, %v1463_v9  ;;  %v1466_v19 = vadd.f32 %v1465_v13, %v3377_v41  ;;  %v1705_v56 = vpack.c.bf16 %v1684_v6, %v1683_v61  ;;  %v1756_v55 = vpop.permute.xlu0 %1755 }
 0x2c8   : > { %v1657_v42 = vadd.f32 %v3437_v5, %v1618_v43  ;;  %v1619_v11 = vadd.f32 %v1587_v8, %v1474_v63  ;;  %v1794_v1 = vsel %vm334_vm1, %v1706_v0, %v1750_v36  ;;  %v1758_v61 = vpop.permute.xlu1 %1757 }
 0x2c9   : > { %v1655_v15 = vadd.f32 %v3437_v5, %v1616_v59  ;;  %v1617_v27 = vadd.f32 %v1585_v12, %v1466_v19  ;;  %v1791_v14 = vsel %vm334_vm1, %v1705_v56, %v1748_v31 }
 0x2ca   : > { %v1658_v47 = vadd.f32 %v3437_v5, %v1619_v11  ;;  %2500 = vmatprep.mubr.msk.bf16.mxu0 %vm809_vm3, %v1791_v14  ;;  %v1689_v49 = vmax.f32 %v1657_v42, 0.0 }
 0x2cb   : > { %v1656_v41 = vadd.f32 %v3437_v5, %v1617_v27  ;;  %v2476_v23 = vpop.f32.mrb[76].mxu1  ;;  %2501 = vmatmul.mubr.msk.bf16.gmra.mrb[68].mxu0 %vm809_vm3, %v1794_v1  ;;  %v1687_v16 = vmax.f32 %v1655_v15, 0.0 }
 0x2cc   : > { %v1690_v50 = vmax.f32 %v1658_v47, 0.0  ;;  %v1487_v53 = vadd.f32 %v2476_v23, %v1322_v28  ;;  %v1478_v38 = vpop.f32.mrb[77].mxu1 }
 0x2cd   : > { %v1688_v24 = vmax.f32 %v1656_v41, 0.0  ;;  %v1479_v35 = vadd.f32 %v1478_v38, %v1320_v52  ;;  %v2477_v18 = vpop.f32.mrb[78].mxu1 }
 0x2ce   : > { %v1622_v37 = vadd.f32 %v3398_v46, %v1487_v53  ;;  %v1490_v54 = vadd.f32 %v2477_v18, %v3413_v25  ;;  %v1481_v39 = vpop.f32.mrb[79].mxu1  ;;  %v1708_v7 = vpack.c.bf16 %v1690_v50, %v1689_v49  ;;  %v1589_v46 = vsel %vm1494_vm9, %v3826_v48, 0.0 }
 0x2cf   : > { %v1620_v60 = vadd.f32 %v3409_v29, %v1479_v35  ;;  %v1482_v21 = vadd.f32 %v1481_v39, %v3423_v33  ;;  %v1707_v4 = vpack.c.bf16 %v1688_v24, %v1687_v16 }
 0x2d0   : > { %v1661_v45 = vadd.f32 %v3437_v5, %v1622_v37  ;;  %v1623_v17 = vadd.f32 %v1591_v20, %v1490_v54  ;;  %v1800_v30 = vsel %vm334_vm1, %v1708_v7, %v1754_v34 }
 0x2d1   : > { %v1659_v25 = vadd.f32 %v3437_v5, %v1620_v60  ;;  %v1621_v22 = vadd.f32 %v1589_v46, %v1482_v21  ;;  %v1797_v29 = vsel %vm334_vm1, %v1707_v4, %v1752_v44 }
 0x2d2   : > { %v1662_v40 = vadd.f32 %v3437_v5, %v1623_v17  ;;  %2504 = vmatprep.mubr.msk.bf16.mxu0 %vm809_vm3, %v1797_v29  ;;  %v1693_v3 = vmax.f32 %v1661_v45, 0.0 }
 0x2d3   : > { %v1660_v33 = vadd.f32 %v3437_v5, %v1621_v22  ;;  %2505 = vmatmul.mubr.msk.bf16.gmra.mrb[72].mxu0 %vm809_vm3, %v1800_v30  ;;  %v1691_v26 = vmax.f32 %v1659_v25, 0.0  ;;  %v3630_v5 = vld [vmem:[%s3791_s6] ss:$0 sm:$0xff] }
 0x2d4   : > { %v1694_v10 = vmax.f32 %v1662_v40, 0.0 }
 0x2d5   : > { %v1692_v57 = vmax.f32 %v1660_v33, 0.0 }
 0x2d6   : > { %v1710_v58 = vpack.c.bf16 %v1694_v10, %v1693_v3 }
 0x2d7   : > { %v1709_v6 = vpack.c.bf16 %v1692_v57, %v1691_v26 }
 0x2d8   : > { %v1806_v62 = vsel %vm334_vm1, %v1710_v58, %v1758_v61 }
 0x2d9   : > { %v1803_v9 = vsel %vm334_vm1, %v1709_v6, %v1756_v55 }
 0x2da   : > { %2508 = vmatprep.mubr.msk.bf16.mxu0 %vm809_vm3, %v1803_v9 }
 0x2db   : > { %2509 = vmatmul.mubr.msk.bf16.gmra.mrb[76].mxu0 %vm809_vm3, %v1806_v62 }
 0x376   : > { %v2482_v51 = vpop.f32.mrb[48].mxu0 }
 0x377   : > { %v1894_v43 = vadd.f32 %v2482_v51, %v3630_v5  ;;  %v1885_v2 = vpop.f32.mrb[49].mxu0 }
 0x378   : > { %v1886_v63 = vadd.f32 %v3630_v5, %v1885_v2  ;;  %v2483_v13 = vpop.f32.mrb[50].mxu0 }
 0x379   : > { %v2014_v0 = vmax.f32 %v1894_v43, 0.0  ;;  %v1897_v31 = vadd.f32 %v2483_v13, %v3630_v5  ;;  %v1888_v32 = vpop.f32.mrb[51].mxu0 }
 0x37a   : > { %v2012_v59 = vmax.f32 %v1886_v63, 0.0  ;;  %v1889_v8 = vadd.f32 %v3630_v5, %v1888_v32 }
 0x37b   : > { %2047 = vst.msk [vmem:[%s3638_s29 + $0x10] sm:$0xff] %vm2044_vm10, %v2014_v0  ;;  %v2015_v19 = vmax.f32 %v1897_v31, 0.0 }
 0x37c   : > { %2045 = vst.msk [vmem:[%s3638_s29] sm:$0xff] %vm2044_vm10, %v2012_v59  ;;  %v2013_v36 = vmax.f32 %v1889_v8, 0.0 }
 0x37d   : > { %2048 = vst.msk [vmem:[%s3638_s29 + $0x18] sm:$0xff] %vm2044_vm10, %v2015_v19 }
 0x37e   : > { %2046 = vst.msk [vmem:[%s3638_s29 + $0x8] sm:$0xff] %vm2044_vm10, %v2013_v36  ;;  %v2486_v56 = vpop.f32.mrb[52].mxu0 }
 0x37f   : > { %v1910_v42 = vadd.f32 %v2486_v56, %v3630_v5  ;;  %v1901_v11 = vpop.f32.mrb[53].mxu0 }
 0x380   : > { %v1902_v12 = vadd.f32 %v3630_v5, %v1901_v11  ;;  %v2487_v15 = vpop.f32.mrb[54].mxu0 }
 0x381   : > { %v2018_v27 = vmax.f32 %v1910_v42, 0.0  ;;  %v1913_v14 = vadd.f32 %v2487_v15, %v3630_v5  ;;  %v1904_v47 = vpop.f32.mrb[55].mxu0 }
 0x382   : > { %v2016_v1 = vmax.f32 %v1902_v12, 0.0  ;;  %v1905_v41 = vadd.f32 %v3630_v5, %v1904_v47 }
 0x383   : > { %2051 = vst.msk [vmem:[%s3638_s29 + $0x30] sm:$0xff] %vm2044_vm10, %v2018_v27  ;;  %v2019_v28 = vmax.f32 %v1913_v14, 0.0 }
 0x384   : > { %2049 = vst.msk [vmem:[%s3638_s29 + $0x20] sm:$0xff] %vm2044_vm10, %v2016_v1  ;;  %v2017_v23 = vmax.f32 %v1905_v41, 0.0 }
 0x385   : > { %2052 = vst.msk [vmem:[%s3638_s29 + $0x38] sm:$0xff] %vm2044_vm10, %v2019_v28 }
 0x386   : > { %2050 = vst.msk [vmem:[%s3638_s29 + $0x28] sm:$0xff] %vm2044_vm10, %v2017_v23  ;;  %v2490_v49 = vpop.f32.mrb[56].mxu0 }
 0x387   : > { %v1926_v50 = vadd.f32 %v2490_v49, %v3630_v5  ;;  %v1917_v53 = vpop.f32.mrb[57].mxu0 }
 0x388   : > { %v1918_v52 = vadd.f32 %v3630_v5, %v1917_v53  ;;  %v2491_v38 = vpop.f32.mrb[58].mxu0 }
 0x389   : > { %v2022_v16 = vmax.f32 %v1926_v50, 0.0  ;;  %v1929_v24 = vadd.f32 %v2491_v38, %v3630_v5  ;;  %v1920_v35 = vpop.f32.mrb[59].mxu0 }
 0x38a   : > { %v2020_v18 = vmax.f32 %v1918_v52, 0.0  ;;  %v1921_v37 = vadd.f32 %v3630_v5, %v1920_v35 }
 0x38b   : > { %2055 = vst.msk [vmem:[%s3638_s29 + $0x50] sm:$0xff] %vm2044_vm10, %v2022_v16  ;;  %v2023_v54 = vmax.f32 %v1929_v24, 0.0 }
 0x38c   : > { %2053 = vst.msk [vmem:[%s3638_s29 + $0x40] sm:$0xff] %vm2044_vm10, %v2020_v18  ;;  %v2021_v39 = vmax.f32 %v1921_v37, 0.0 }
 0x38d   : > { %2056 = vst.msk [vmem:[%s3638_s29 + $0x58] sm:$0xff] %vm2044_vm10, %v2023_v54 }
 0x38e   : > { %2054 = vst.msk [vmem:[%s3638_s29 + $0x48] sm:$0xff] %vm2044_vm10, %v2021_v39  ;;  %v2494_v7 = vpop.f32.mrb[60].mxu0 }
 0x38f   : > { %v1942_v44 = vadd.f32 %v2494_v7, %v3630_v5  ;;  %v1933_v60 = vpop.f32.mrb[61].mxu0 }
 0x390   : > { %v1934_v20 = vadd.f32 %v3630_v5, %v1933_v60  ;;  %v2495_v21 = vpop.f32.mrb[62].mxu0 }
 0x391   : > { %v2026_v34 = vmax.f32 %v1942_v44, 0.0  ;;  %v1945_v4 = vadd.f32 %v2495_v21, %v3630_v5  ;;  %v1936_v45 = vpop.f32.mrb[63].mxu0 }
 0x392   : > { %v2024_v17 = vmax.f32 %v1934_v20, 0.0  ;;  %v1937_v48 = vadd.f32 %v3630_v5, %v1936_v45 }
 0x393   : > { %2059 = vst.msk [vmem:[%s3638_s29 + $0x70] sm:$0xff] %vm2044_vm10, %v2026_v34  ;;  %v2027_v46 = vmax.f32 %v1945_v4, 0.0 }
 0x394   : > { %2057 = vst.msk [vmem:[%s3638_s29 + $0x60] sm:$0xff] %vm2044_vm10, %v2024_v17  ;;  %v2025_v25 = vmax.f32 %v1937_v48, 0.0 }
 0x395   : > { %2060 = vst.msk [vmem:[%s3638_s29 + $0x78] sm:$0xff] %vm2044_vm10, %v2027_v46 }
 0x396   : > { %2058 = vst.msk [vmem:[%s3638_s29 + $0x68] sm:$0xff] %vm2044_vm10, %v2025_v25  ;;  %v2498_v22 = vpop.f32.mrb[64].mxu0 }
 0x397   : > { %v1958_v29 = vadd.f32 %v2498_v22, %v3630_v5  ;;  %v1949_v40 = vpop.f32.mrb[65].mxu0 }
 0x398   : > { %v1950_v30 = vadd.f32 %v3630_v5, %v1949_v40  ;;  %v2499_v33 = vpop.f32.mrb[66].mxu0 }
 0x399   : > { %v2030_v3 = vmax.f32 %v1958_v29, 0.0  ;;  %v1961_v10 = vadd.f32 %v2499_v33, %v3630_v5  ;;  %v1952_v26 = vpop.f32.mrb[67].mxu0 }
 0x39a   : > { %v2028_v57 = vmax.f32 %v1950_v30, 0.0  ;;  %v1953_v58 = vadd.f32 %v3630_v5, %v1952_v26 }
 0x39b   : > { %2063 = vst.msk [vmem:[%s3638_s29 + $0x90] sm:$0xff] %vm2044_vm10, %v2030_v3  ;;  %v2031_v55 = vmax.f32 %v1961_v10, 0.0 }
 0x39c   : > { %2061 = vst.msk [vmem:[%s3638_s29 + $0x80] sm:$0xff] %vm2044_vm10, %v2028_v57  ;;  %v2029_v61 = vmax.f32 %v1953_v58, 0.0 }
 0x39d   : > { %2064 = vst.msk [vmem:[%s3638_s29 + $0x98] sm:$0xff] %vm2044_vm10, %v2031_v55 }
 0x39e   : > { %2062 = vst.msk [vmem:[%s3638_s29 + $0x88] sm:$0xff] %vm2044_vm10, %v2029_v61  ;;  %v2502_v6 = vpop.f32.mrb[68].mxu0 }
 0x39f   : > { %v1974_v9 = vadd.f32 %v2502_v6, %v3630_v5  ;;  %v1965_v62 = vpop.f32.mrb[69].mxu0 }
 0x3a0   : > { %v1966_v51 = vadd.f32 %v3630_v5, %v1965_v62  ;;  %v2503_v43 = vpop.f32.mrb[70].mxu0 }
 0x3a1   : > { %v2034_v2 = vmax.f32 %v1974_v9, 0.0  ;;  %v1977_v63 = vadd.f32 %v2503_v43, %v3630_v5  ;;  %v1968_v13 = vpop.f32.mrb[71].mxu0 }
 0x3a2   : > { %v2032_v0 = vmax.f32 %v1966_v51, 0.0  ;;  %v1969_v31 = vadd.f32 %v3630_v5, %v1968_v13 }
 0x3a3   : > { %2067 = vst.msk [vmem:[%s3638_s29 + $0xb0] sm:$0xff] %vm2044_vm10, %v2034_v2  ;;  %v2035_v32 = vmax.f32 %v1977_v63, 0.0 }
 0x3a4   : > { %2065 = vst.msk [vmem:[%s3638_s29 + $0xa0] sm:$0xff] %vm2044_vm10, %v2032_v0  ;;  %v2033_v59 = vmax.f32 %v1969_v31, 0.0 }
 0x3a5   : > { %2068 = vst.msk [vmem:[%s3638_s29 + $0xb8] sm:$0xff] %vm2044_vm10, %v2035_v32 }
 0x3a6   : > { %2066 = vst.msk [vmem:[%s3638_s29 + $0xa8] sm:$0xff] %vm2044_vm10, %v2033_v59  ;;  %v2506_v8 = vpop.f32.mrb[72].mxu0 }
 0x3a7   : > { %v1990_v19 = vadd.f32 %v2506_v8, %v3630_v5  ;;  %v1981_v36 = vpop.f32.mrb[73].mxu0 }
 0x3a8   : > { %v1982_v56 = vadd.f32 %v3630_v5, %v1981_v36  ;;  %v2507_v42 = vpop.f32.mrb[74].mxu0 }
 0x3a9   : > { %v2038_v11 = vmax.f32 %v1990_v19, 0.0  ;;  %v1993_v12 = vadd.f32 %v2507_v42, %v3630_v5  ;;  %v1984_v15 = vpop.f32.mrb[75].mxu0 }
 0x3aa   : > { %v2036_v27 = vmax.f32 %v1982_v56, 0.0  ;;  %v1985_v14 = vadd.f32 %v3630_v5, %v1984_v15 }
 0x3ab   : > { %2071 = vst.msk [vmem:[%s3638_s29 + $0xd0] sm:$0xff] %vm2044_vm10, %v2038_v11  ;;  %v2039_v47 = vmax.f32 %v1993_v12, 0.0 }
 0x3ac   : > { %2069 = vst.msk [vmem:[%s3638_s29 + $0xc0] sm:$0xff] %vm2044_vm10, %v2036_v27  ;;  %v2037_v1 = vmax.f32 %v1985_v14, 0.0 }
 0x3ad   : > { %2072 = vst.msk [vmem:[%s3638_s29 + $0xd8] sm:$0xff] %vm2044_vm10, %v2039_v47 }
 0x3ae   : > { %2070 = vst.msk [vmem:[%s3638_s29 + $0xc8] sm:$0xff] %vm2044_vm10, %v2037_v1  ;;  %v2510_v41 = vpop.f32.mrb[76].mxu0 }
 0x3af   : > { %v2006_v28 = vadd.f32 %v2510_v41, %v3630_v5  ;;  %v1997_v23 = vpop.f32.mrb[77].mxu0 }
 0x3b0   : > { %v1998_v49 = vadd.f32 %v3630_v5, %v1997_v23  ;;  %v2511_v50 = vpop.f32.mrb[78].mxu0 }
 0x3b1   : > { %v2042_v53 = vmax.f32 %v2006_v28, 0.0  ;;  %v2009_v52 = vadd.f32 %v2511_v50, %v3630_v5  ;;  %v2000_v38 = vpop.f32.mrb[79].mxu0 }
 0x3b2   : > { %v2040_v16 = vmax.f32 %v1998_v49, 0.0  ;;  %v2001_v24 = vadd.f32 %v3630_v5, %v2000_v38 }
 0x3b3   : > { %2075 = vst.msk [vmem:[%s3638_s29 + $0xf0] sm:$0xff] %vm2044_vm10, %v2042_v53  ;;  %v2043_v35 = vmax.f32 %v2009_v52, 0.0 }
 0x3b4   : > { %2073 = vst.msk [vmem:[%s3638_s29 + $0xe0] sm:$0xff] %vm2044_vm10, %v2040_v16  ;;  %v2041_v18 = vmax.f32 %v2001_v24, 0.0 }
 0x3b5   : > { %2076 = vst.msk [vmem:[%s3638_s29 + $0xf8] sm:$0xff] %vm2044_vm10, %v2043_v35 }
 0x3b6   : > { %2074 = vst.msk [vmem:[%s3638_s29 + $0xe8] sm:$0xff] %vm2044_vm10, %v2041_v18 }
 0x3b7   : > { %2579 = shalt.err (!%p2576_p3)
}
 0x3b8   : > { %s2580_s20 = scalar_lea.hbm %s3731_s16, 4096  ;;  %s2584_s29 = scalar_lea.hbm %s3792_s7, 8192 }
 0x3b9   : > { %p2581_p4 = scmp.ne.s32.totalorder %s3731_s16, %s2580_s20  ;;  %p2585_p9 = scmp.lt.u32.totalorder %s3731_s16, %s3792_s7 }
 0x3ba   : > { %p2586_p10 = scmp.lt.u32.totalorder %s2584_s29, %s2580_s20  ;;  %p2588_p12 = scmp.lt.u32.totalorder %s2580_s20, %s3731_s16 }
 0x3bb   : > { %p2582_p7 = pnand %p2581_p4, %p2713_p5 }
 0x3bc   : > { %p2587_p11 = por %p2586_p10, %p2585_p9 }
 0x3bd   : > { %p2583_p8 = pneg %p2582_p7 }
 0x3be   : > { %p2589_p13 = por %p2588_p12, %p2587_p11 }
 0x3c0   : > { %p2590_p0 = pnand %p2589_p13, %p2583_p8 }
 0x3c2   : > { %2593 = shalt.err (!%p2590_p0)
}
 0x3c3   : > { %s2634_s15 = smov 128  }
 0x3c4   : > { %2520 = dma.vmem_to_hbm [thread:$0]  (%p2713_p5), %s3735_s9, 4096, %s3731_s16, %s3743_s28, %s2634_s15, %s2634_s15, %s2631_s14  }
 0x3c5 PF: > { %p2526_p1 = scmp.ge.s32.totalorder %s2628_s27, 2  ;;  %s2106_s17 = sand.u32 1, %s2616_s24  }
 0x3c6   : > { %s2107_s18 = scalar_lea.sflag [#allocation4], %s2106_s17 }
 0x3c7   : > { %p2523_p2 = pnand %p2526_p1, %p2717_p6 }
 0x3c9   : > { %2611 = dma.done.wait (!%p2523_p2), %s2107_s18, 4096  }
 0x3ca   : > { %2613 = vsyncadd (!%p2523_p2), %s2107_s18, 4294963200  ;;  %p17_p3 = scmp.ge.s32.totalorder %s2700_s30, 4   ;;  %s3827_s24 = smov %s2620_s25 }
 0x3cb   : > { %s3828_s25 = smov %s2624_s26  ;;  %s3829_s26 = smov %s2711_s10 }
 0x3cc   : > { %s3830_s27 = smov %s2700_s30  ;;  %19 = sbr.rel (!%p17_p3) target bundleno = 3 (0x3), region = 88 }
 0x3d3   :  { %2112 = vsyncpa [#allocation4], 1 }
 0x3d4   :  { %2114 = vsyncpa [#allocation4 + $0x1], 1 }

</bundles_post_ra>
